<compile_context>
chip_gen: v7x
topology: tpu7x:2x2x1
jax: 0.10.0
libtpu: 0.0.40
codegen_flags: <defaults>
</compile_context>

<pallas_src>
import jax
import jax.numpy as jnp
import numpy as np
from jax import lax
from jax.experimental import pallas as pl
from jax.experimental.pallas import tpu as pltpu


def gru_seq_kernel(x_ref,      # VMEM (T, H)  bf16  embedded tokens (gathered in wrapper)
                   h0_ref,     # VMEM (1, H)  f32   initial hidden
                   wih_ref,    # VMEM (H, 3H) bf16  fused input-side gate weights  (r|z|n)
                   whh_ref,    # VMEM (H, 3H) bf16  fused hidden-side gate weights (r|z|n)
                   bih_ref,    # VMEM (1, 3H) f32
                   bhh_ref,    # VMEM (1, 3H) f32
                   out_ref,    # VMEM (T, H)  f32   per-step hidden states (single dense writeback)
                   gi_ref):    # VMEM (T, 3H) f32   scratch: hoisted input-side pre-activations
    T, H = out_ref.shape
    cdt = whh_ref.dtype   # bf16 MXU operands, f32 accumulation

    # (1) Hoisted input-side matmul for the WHOLE sequence: fills MXU rows (M=T)
    #     instead of T matvecs at M=1.
    gi_ref[...] = (jnp.dot(x_ref[...], wih_ref[...],
                           preferred_element_type=jnp.float32)
                   + bih_ref[...])                                    # (T, 3H) f32

    # (2) Serial GRU recurrence: only gh = h @ W_hh stays inside the loop.
    def step(t, h):                                                   # h: (1, H) f32
        gh = (jnp.dot(h.astype(cdt), whh_ref[...],
                      preferred_element_type=jnp.float32)
              + bhh_ref[...])                                         # (1, 3H) f32
        gi = gi_ref[pl.ds(t, 1), :]                                   # (1, 3H) f32

        i_r, i_z, i_n = gi[:, 0:H], gi[:, H:2 * H], gi[:, 2 * H:3 * H]
        h_r, h_z, h_n = gh[:, 0:H], gh[:, H:2 * H], gh[:, 2 * H:3 * H]

        # PyTorch nn.GRU single-step semantics (f32 elementwise math).
        r = jax.nn.sigmoid(i_r + h_r)
        z = jax.nn.sigmoid(i_z + h_z)
        n = jnp.tanh(i_n + r * h_n)
        h_new = (1.0 - z) * n + z * h                                 # (1, H) f32

        out_ref[pl.ds(t, 1), :] = h_new      # VMEM write; one dense (T,H) HBM DMA at the end
        return h_new

    # Static trip count -> unrolled so the LLO scheduler can overlap step t's
    # EUP/VPU gate math with step t+1's matmul push.
    lax.fori_loop(0, T, step, h0_ref[...], unroll=True)


def encoder_rnn_forward(tokens, hidden, params):
    """tokens: (T,) int32 ; hidden: (1,1,H) f32 -> (outputs (T,1,H), hidden (1,1,H))."""
    emb = params["embedding"]      # (V, H)   f32
    wih = params["w_ih"]           # (H, 3H)  bf16
    whh = params["w_hh"]           # (H, 3H)  bf16
    bih = params["b_ih"]           # (1, 3H)  f32
    bhh = params["b_hh"]           # (1, 3H)  f32
    V, H = emb.shape
    T = tokens.shape[0]

    # Embedding gather in plain XLA (off the serial critical path); bf16 rows
    # halve the HBM->VMEM traffic and feed the MXU directly.
    x = jnp.take(emb, tokens.astype(jnp.int32), axis=0).astype(wih.dtype)   # (T, H)
    h0 = hidden.reshape(1, H).astype(jnp.float32)

    def full(shape):
        # Whole array as one resident VMEM block (grid has a single step).
        return pl.BlockSpec(shape, lambda i, n=len(shape): (0,) * n)

    out = pl.pallas_call(
        gru_seq_kernel,
        out_shape=jax.ShapeDtypeStruct((T, H), jnp.float32),
        grid=(1,),                                   # single grid step: no per-step pipeline overhead
        in_specs=[
            full((T, H)),                            # X (embedded tokens)
            full((1, H)),                            # h0
            full((H, 3 * H)),                        # W_ih
            full((H, 3 * H)),                        # W_hh
            full((1, 3 * H)),                        # b_ih
            full((1, 3 * H)),                        # b_hh
        ],
        out_specs=full((T, H)),
        scratch_shapes=[pltpu.VMEM((T, 3 * H), jnp.float32)],   # hoisted GI slab
        compiler_params=pltpu.CompilerParams(
            dimension_semantics=("arbitrary",)),     # time recurrence: never mark parallel
    )(x, h0, wih, whh, bih, bhh)

    outputs = out.reshape(T, 1, H)
    final_hidden = out[-1:].reshape(1, 1, H)         # 1-layer GRU: last output == final hidden
    return outputs, final_hidden
    # TODO(synk): for large H (>= ~832 on v5e's 16 MiB scoped default, >= 2048 on
    # v7x's 64 MiB VMEM) set pltpu.CompilerParams(vmem_limit_bytes=...) and/or
    # single-buffer the resident weight blocks; for batch > 1 stack streams so the
    # recurrent LHS is (B, H) with B >= 8 and add a 'parallel' batch grid axis.


def reference_forward(tokens, hidden, params):
    """Pure-JAX reference with the same precision policy (bf16 operands, f32 accum)."""
    emb, wih, whh = params["embedding"], params["w_ih"], params["w_hh"]
    bih, bhh = params["b_ih"], params["b_hh"]
    H = emb.shape[1]
    cdt = wih.dtype
    x = jnp.take(emb, tokens.astype(jnp.int32), axis=0).astype(cdt)          # (T, H)
    gi_all = jnp.dot(x, wih, preferred_element_type=jnp.float32) + bih       # (T, 3H)
    h = hidden.reshape(1, H).astype(jnp.float32)
    outs = []
    for t in range(x.shape[0]):
        gh = jnp.dot(h.astype(cdt), whh, preferred_element_type=jnp.float32) + bhh
        gi = gi_all[t:t + 1]
        i_r, i_z, i_n = gi[:, :H], gi[:, H:2 * H], gi[:, 2 * H:]
        h_r, h_z, h_n = gh[:, :H], gh[:, H:2 * H], gh[:, 2 * H:]
        r = jax.nn.sigmoid(i_r + h_r)
        z = jax.nn.sigmoid(i_z + h_z)
        n = jnp.tanh(i_n + r * h_n)
        h = (1.0 - z) * n + z * h
        outs.append(h)
    return jnp.stack(outs, axis=0), h.reshape(1, 1, H)


def init_params(key, input_size, hidden_size, compute_dtype=jnp.bfloat16):
    """Shapes matching nn.Embedding(V,H) + nn.GRU(H,H), fused/pre-transposed for the kernel."""
    k_emb, k_wih, k_whh, k_bih, k_bhh = jax.random.split(key, 5)
    bound = 1.0 / np.sqrt(hidden_size)
    # PyTorch weight_ih_l0 is (3H, H) stacked [r; z; n]; stored here pre-transposed
    # and gate-fused as (H, 3H) so all three gate matmuls are one X @ W.
    w_ih = jax.random.uniform(k_wih, (hidden_size, 3 * hidden_size),
                              jnp.float32, -bound, bound)
    w_hh = jax.random.uniform(k_whh, (hidden_size, 3 * hidden_size),
                              jnp.float32, -bound, bound)
    b_ih = jax.random.uniform(k_bih, (1, 3 * hidden_size), jnp.float32, -bound, bound)
    b_hh = jax.random.uniform(k_bhh, (1, 3 * hidden_size), jnp.float32, -bound, bound)
    embedding = jax.random.normal(k_emb, (input_size, hidden_size), jnp.float32)
    return {"embedding": embedding,
            "w_ih": w_ih.astype(compute_dtype),
            "w_hh": w_hh.astype(compute_dtype),
            "b_ih": b_ih, "b_hh": b_hh}


if __name__ == "__main__":
    vocab_size = 64
    hidden_size = 128       # multiple of 128 -> lane-dense gate math and stores
    seq_len = 8

    params = init_params(jax.random.PRNGKey(0), vocab_size, hidden_size)
    tokens = jax.random.randint(jax.random.PRNGKey(1), (seq_len,), 0, vocab_size,
                                dtype=jnp.int32)
    hidden0 = jnp.zeros((1, 1, hidden_size), dtype=jnp.float32)   # initHidden()

    # Whole sequence in one kernel launch (hoisted GI matmul + in-kernel recurrence).
    outputs, hidden_T = encoder_rnn_forward(tokens, hidden0, params)
    jax.block_until_ready((outputs, hidden_T))
    assert outputs.shape == (seq_len, 1, hidden_size)
    assert hidden_T.shape == (1, 1, hidden_size)

    # Single-step call == original EncoderRNN.forward(input, hidden).
    out1, hid1 = encoder_rnn_forward(tokens[:1], hidden0, params)
    jax.block_until_ready((out1, hid1))
    assert out1.shape == (1, 1, hidden_size)
    assert hid1.shape == (1, 1, hidden_size)

    # Numerical check against the pure-JAX reference (same precision policy).
    ref_out, ref_hid = reference_forward(tokens, hidden0, params)
    assert np.allclose(np.asarray(outputs), np.asarray(ref_out), atol=2e-3, rtol=2e-3)
    assert np.allclose(np.asarray(hidden_T), np.asarray(ref_hid), atol=2e-3, rtol=2e-3)

    ref1_out, ref1_hid = reference_forward(tokens[:1], hidden0, params)
    assert np.allclose(np.asarray(out1), np.asarray(ref1_out), atol=2e-3, rtol=2e-3)
    assert np.allclose(np.asarray(hid1), np.asarray(ref1_hid), atol=2e-3, rtol=2e-3)

    print("KERNEL_OK")
</pallas_src>

<mosaic_0001>
module attributes {stable_mosaic.version = 11 : i64} {
  func.func @gru_seq_kernel(%arg0: i32, %arg1: memref<8x128xbf16, #tpu.memory_space<vmem>>, %arg2: memref<1x128xf32, #tpu.memory_space<vmem>>, %arg3: memref<128x384xbf16, #tpu.memory_space<vmem>>, %arg4: memref<128x384xbf16, #tpu.memory_space<vmem>>, %arg5: memref<1x384xf32, #tpu.memory_space<vmem>>, %arg6: memref<1x384xf32, #tpu.memory_space<vmem>>, %arg7: memref<8x128xf32, #tpu.memory_space<vmem>>, %arg8: memref<8x384xf32, #tpu.memory_space<vmem>>) attributes {dimension_semantics = [#tpu.dimension_semantics<arbitrary>], iteration_bounds = array<i64: 1>, scalar_prefetch = 0 : i64, scratch_operands = 1 : i64, tpu.core_type = #tpu.core_type<tc>, window_params = [{pipeline_mode = #tpu.pipeline_mode<synchronous>, transform_indices = @transform_0, window_bounds = array<i64: 8, 128>}, {pipeline_mode = #tpu.pipeline_mode<synchronous>, transform_indices = @transform_1, window_bounds = array<i64: 1, 128>}, {pipeline_mode = #tpu.pipeline_mode<synchronous>, transform_indices = @transform_2, window_bounds = array<i64: 128, 384>}, {pipeline_mode = #tpu.pipeline_mode<synchronous>, transform_indices = @transform_3, window_bounds = array<i64: 128, 384>}, {pipeline_mode = #tpu.pipeline_mode<synchronous>, transform_indices = @transform_4, window_bounds = array<i64: 1, 384>}, {pipeline_mode = #tpu.pipeline_mode<synchronous>, transform_indices = @transform_5, window_bounds = array<i64: 1, 384>}, {pipeline_mode = #tpu.pipeline_mode<synchronous>, transform_indices = @transform_6, window_bounds = array<i64: 8, 128>}]} {
    %c0 = arith.constant 0 : index
    %c0_0 = arith.constant 0 : index
    %0 = vector.load %arg1[%c0, %c0_0] : memref<8x128xbf16, #tpu.memory_space<vmem>>, vector<8x128xbf16>
    %c0_1 = arith.constant 0 : index
    %c0_2 = arith.constant 0 : index
    %1 = vector.load %arg3[%c0_1, %c0_2] : memref<128x384xbf16, #tpu.memory_space<vmem>>, vector<128x384xbf16>
    %cst = arith.constant dense<0.000000e+00> : vector<8x384xf32>
    %2 = tpu.matmul %0, %1, %cst {dimension_numbers = #tpu.dot_dimension_numbers<[1], [0], [0], [1], [0, 0, 1, 1], [], []>} : vector<8x128xbf16>, vector<128x384xbf16>, vector<8x384xf32> -> vector<8x384xf32>
    %c0_3 = arith.constant 0 : index
    %c0_4 = arith.constant 0 : index
    %3 = vector.load %arg5[%c0_3, %c0_4] : memref<1x384xf32, #tpu.memory_space<vmem>>, vector<1x384xf32>
    %4 = vector.broadcast %3 : vector<1x384xf32> to vector<8x384xf32>
    %5 = arith.addf %2, %4 : vector<8x384xf32>
    %c0_5 = arith.constant 0 : index
    %c0_6 = arith.constant 0 : index
    %6 = vector.load %arg8[%c0_5, %c0_6] : memref<8x384xf32, #tpu.memory_space<vmem>>, vector<8x384xf32>
    tpu.vector_store %arg8[%c0_5, %c0_6], %5 {strides = array<i32>} : memref<8x384xf32, #tpu.memory_space<vmem>>, vector<8x384xf32>,
    %c0_7 = arith.constant 0 : index
    %c0_8 = arith.constant 0 : index
    %7 = vector.load %arg2[%c0_7, %c0_8] : memref<1x128xf32, #tpu.memory_space<vmem>>, vector<1x128xf32>
    %c0_i32 = arith.constant 0 : i32
    %8 = arith.truncf %7 : vector<1x128xf32> to vector<1x128xbf16>
    %c0_9 = arith.constant 0 : index
    %c0_10 = arith.constant 0 : index
    %9 = vector.load %arg4[%c0_9, %c0_10] : memref<128x384xbf16, #tpu.memory_space<vmem>>, vector<128x384xbf16>
    %cst_11 = arith.constant dense<0.000000e+00> : vector<1x384xf32>
    %10 = tpu.matmul %8, %9, %cst_11 {dimension_numbers = #tpu.dot_dimension_numbers<[1], [0], [0], [1], [0, 0, 1, 1], [], []>} : vector<1x128xbf16>, vector<128x384xbf16>, vector<1x384xf32> -> vector<1x384xf32>
    %c0_12 = arith.constant 0 : index
    %c0_13 = arith.constant 0 : index
    %11 = vector.load %arg6[%c0_12, %c0_13] : memref<1x384xf32, #tpu.memory_space<vmem>>, vector<1x384xf32>
    %12 = arith.addf %10, %11 : vector<1x384xf32>
    %13 = arith.index_cast %c0_i32 : i32 to index
    %c0_14 = arith.constant 0 : index
    %14 = vector.load %arg8[%13, %c0_14] : memref<8x384xf32, #tpu.memory_space<vmem>>, vector<1x384xf32>
    %15 = vector.extract_strided_slice %14 {offsets = [0, 0], sizes = [1, 128], strides = [1, 1]} : vector<1x384xf32> to vector<1x128xf32>
    %16 = vector.extract_strided_slice %14 {offsets = [0, 128], sizes = [1, 128], strides = [1, 1]} : vector<1x384xf32> to vector<1x128xf32>
    %17 = vector.extract_strided_slice %14 {offsets = [0, 256], sizes = [1, 128], strides = [1, 1]} : vector<1x384xf32> to vector<1x128xf32>
    %18 = vector.extract_strided_slice %12 {offsets = [0, 0], sizes = [1, 128], strides = [1, 1]} : vector<1x384xf32> to vector<1x128xf32>
    %19 = vector.extract_strided_slice %12 {offsets = [0, 128], sizes = [1, 128], strides = [1, 1]} : vector<1x384xf32> to vector<1x128xf32>
    %20 = vector.extract_strided_slice %12 {offsets = [0, 256], sizes = [1, 128], strides = [1, 1]} : vector<1x384xf32> to vector<1x128xf32>
    %21 = arith.addf %15, %18 : vector<1x128xf32>
    %22 = arith.negf %21 : vector<1x128xf32>
    %23 = math.exp %22 : vector<1x128xf32>
    %cst_15 = arith.constant 1.000000e+00 : f32
    %24 = vector.broadcast %cst_15 : f32 to vector<1x128xf32>
    %25 = arith.addf %24, %23 : vector<1x128xf32>
    %26 = arith.divf %24, %25 : vector<1x128xf32>
    %27 = arith.addf %16, %19 : vector<1x128xf32>
    %28 = arith.negf %27 : vector<1x128xf32>
    %29 = math.exp %28 : vector<1x128xf32>
    %cst_16 = arith.constant 1.000000e+00 : f32
    %30 = vector.broadcast %cst_16 : f32 to vector<1x128xf32>
    %31 = arith.addf %30, %29 : vector<1x128xf32>
    %32 = arith.divf %30, %31 : vector<1x128xf32>
    %33 = arith.mulf %26, %20 : vector<1x128xf32>
    %34 = arith.addf %17, %33 : vector<1x128xf32>
    %35 = math.tanh %34 : vector<1x128xf32>
    %cst_17 = arith.constant 1.000000e+00 : f32
    %36 = vector.broadcast %cst_17 : f32 to vector<1x128xf32>
    %37 = arith.subf %36, %32 : vector<1x128xf32>
    %38 = arith.mulf %37, %35 : vector<1x128xf32>
    %39 = arith.mulf %32, %7 : vector<1x128xf32>
    %40 = arith.addf %38, %39 : vector<1x128xf32>
    %41 = arith.index_cast %c0_i32 : i32 to index
    %c0_18 = arith.constant 0 : index
    %42 = vector.load %arg7[%41, %c0_18] : memref<8x128xf32, #tpu.memory_space<vmem>>, vector<1x128xf32>
    tpu.vector_store %arg7[%41, %c0_18], %40 {strides = array<i32>} : memref<8x128xf32, #tpu.memory_space<vmem>>, vector<1x128xf32>,
    %c1_i32 = arith.constant 1 : i32
    %43 = arith.truncf %40 : vector<1x128xf32> to vector<1x128xbf16>
    %c0_19 = arith.constant 0 : index
    %c0_20 = arith.constant 0 : index
    %44 = vector.load %arg4[%c0_19, %c0_20] : memref<128x384xbf16, #tpu.memory_space<vmem>>, vector<128x384xbf16>
    %cst_21 = arith.constant dense<0.000000e+00> : vector<1x384xf32>
    %45 = tpu.matmul %43, %44, %cst_21 {dimension_numbers = #tpu.dot_dimension_numbers<[1], [0], [0], [1], [0, 0, 1, 1], [], []>} : vector<1x128xbf16>, vector<128x384xbf16>, vector<1x384xf32> -> vector<1x384xf32>
    %c0_22 = arith.constant 0 : index
    %c0_23 = arith.constant 0 : index
    %46 = vector.load %arg6[%c0_22, %c0_23] : memref<1x384xf32, #tpu.memory_space<vmem>>, vector<1x384xf32>
    %47 = arith.addf %45, %46 : vector<1x384xf32>
    %48 = arith.index_cast %c1_i32 : i32 to index
    %c0_24 = arith.constant 0 : index
    %49 = vector.load %arg8[%48, %c0_24] : memref<8x384xf32, #tpu.memory_space<vmem>>, vector<1x384xf32>
    %50 = vector.extract_strided_slice %49 {offsets = [0, 0], sizes = [1, 128], strides = [1, 1]} : vector<1x384xf32> to vector<1x128xf32>
    %51 = vector.extract_strided_slice %49 {offsets = [0, 128], sizes = [1, 128], strides = [1, 1]} : vector<1x384xf32> to vector<1x128xf32>
    %52 = vector.extract_strided_slice %49 {offsets = [0, 256], sizes = [1, 128], strides = [1, 1]} : vector<1x384xf32> to vector<1x128xf32>
    %53 = vector.extract_strided_slice %47 {offsets = [0, 0], sizes = [1, 128], strides = [1, 1]} : vector<1x384xf32> to vector<1x128xf32>
    %54 = vector.extract_strided_slice %47 {offsets = [0, 128], sizes = [1, 128], strides = [1, 1]} : vector<1x384xf32> to vector<1x128xf32>
    %55 = vector.extract_strided_slice %47 {offsets = [0, 256], sizes = [1, 128], strides = [1, 1]} : vector<1x384xf32> to vector<1x128xf32>
    %56 = arith.addf %50, %53 : vector<1x128xf32>
    %57 = arith.negf %56 : vector<1x128xf32>
    %58 = math.exp %57 : vector<1x128xf32>
    %cst_25 = arith.constant 1.000000e+00 : f32
    %59 = vector.broadcast %cst_25 : f32 to vector<1x128xf32>
    %60 = arith.addf %59, %58 : vector<1x128xf32>
    %61 = arith.divf %59, %60 : vector<1x128xf32>
    %62 = arith.addf %51, %54 : vector<1x128xf32>
    %63 = arith.negf %62 : vector<1x128xf32>
    %64 = math.exp %63 : vector<1x128xf32>
    %cst_26 = arith.constant 1.000000e+00 : f32
    %65 = vector.broadcast %cst_26 : f32 to vector<1x128xf32>
    %66 = arith.addf %65, %64 : vector<1x128xf32>
    %67 = arith.divf %65, %66 : vector<1x128xf32>
    %68 = arith.mulf %61, %55 : vector<1x128xf32>
    %69 = arith.addf %52, %68 : vector<1x128xf32>
    %70 = math.tanh %69 : vector<1x128xf32>
    %cst_27 = arith.constant 1.000000e+00 : f32
    %71 = vector.broadcast %cst_27 : f32 to vector<1x128xf32>
    %72 = arith.subf %71, %67 : vector<1x128xf32>
    %73 = arith.mulf %72, %70 : vector<1x128xf32>
    %74 = arith.mulf %67, %40 : vector<1x128xf32>
    %75 = arith.addf %73, %74 : vector<1x128xf32>
    %76 = arith.index_cast %c1_i32 : i32 to index
    %c0_28 = arith.constant 0 : index
    %77 = vector.load %arg7[%76, %c0_28] : memref<8x128xf32, #tpu.memory_space<vmem>>, vector<1x128xf32>
    tpu.vector_store %arg7[%76, %c0_28], %75 {strides = array<i32>} : memref<8x128xf32, #tpu.memory_space<vmem>>, vector<1x128xf32>,
    %c2_i32 = arith.constant 2 : i32
    %78 = arith.truncf %75 : vector<1x128xf32> to vector<1x128xbf16>
    %c0_29 = arith.constant 0 : index
    %c0_30 = arith.constant 0 : index
    %79 = vector.load %arg4[%c0_29, %c0_30] : memref<128x384xbf16, #tpu.memory_space<vmem>>, vector<128x384xbf16>
    %cst_31 = arith.constant dense<0.000000e+00> : vector<1x384xf32>
    %80 = tpu.matmul %78, %79, %cst_31 {dimension_numbers = #tpu.dot_dimension_numbers<[1], [0], [0], [1], [0, 0, 1, 1], [], []>} : vector<1x128xbf16>, vector<128x384xbf16>, vector<1x384xf32> -> vector<1x384xf32>
    %c0_32 = arith.constant 0 : index
    %c0_33 = arith.constant 0 : index
    %81 = vector.load %arg6[%c0_32, %c0_33] : memref<1x384xf32, #tpu.memory_space<vmem>>, vector<1x384xf32>
    %82 = arith.addf %80, %81 : vector<1x384xf32>
    %83 = arith.index_cast %c2_i32 : i32 to index
    %c0_34 = arith.constant 0 : index
    %84 = vector.load %arg8[%83, %c0_34] : memref<8x384xf32, #tpu.memory_space<vmem>>, vector<1x384xf32>
    %85 = vector.extract_strided_slice %84 {offsets = [0, 0], sizes = [1, 128], strides = [1, 1]} : vector<1x384xf32> to vector<1x128xf32>
    %86 = vector.extract_strided_slice %84 {offsets = [0, 128], sizes = [1, 128], strides = [1, 1]} : vector<1x384xf32> to vector<1x128xf32>
    %87 = vector.extract_strided_slice %84 {offsets = [0, 256], sizes = [1, 128], strides = [1, 1]} : vector<1x384xf32> to vector<1x128xf32>
    %88 = vector.extract_strided_slice %82 {offsets = [0, 0], sizes = [1, 128], strides = [1, 1]} : vector<1x384xf32> to vector<1x128xf32>
    %89 = vector.extract_strided_slice %82 {offsets = [0, 128], sizes = [1, 128], strides = [1, 1]} : vector<1x384xf32> to vector<1x128xf32>
    %90 = vector.extract_strided_slice %82 {offsets = [0, 256], sizes = [1, 128], strides = [1, 1]} : vector<1x384xf32> to vector<1x128xf32>
    %91 = arith.addf %85, %88 : vector<1x128xf32>
    %92 = arith.negf %91 : vector<1x128xf32>
    %93 = math.exp %92 : vector<1x128xf32>
    %cst_35 = arith.constant 1.000000e+00 : f32
    %94 = vector.broadcast %cst_35 : f32 to vector<1x128xf32>
    %95 = arith.addf %94, %93 : vector<1x128xf32>
    %96 = arith.divf %94, %95 : vector<1x128xf32>
    %97 = arith.addf %86, %89 : vector<1x128xf32>
    %98 = arith.negf %97 : vector<1x128xf32>
    %99 = math.exp %98 : vector<1x128xf32>
    %cst_36 = arith.constant 1.000000e+00 : f32
    %100 = vector.broadcast %cst_36 : f32 to vector<1x128xf32>
    %101 = arith.addf %100, %99 : vector<1x128xf32>
    %102 = arith.divf %100, %101 : vector<1x128xf32>
    %103 = arith.mulf %96, %90 : vector<1x128xf32>
    %104 = arith.addf %87, %103 : vector<1x128xf32>
    %105 = math.tanh %104 : vector<1x128xf32>
    %cst_37 = arith.constant 1.000000e+00 : f32
    %106 = vector.broadcast %cst_37 : f32 to vector<1x128xf32>
    %107 = arith.subf %106, %102 : vector<1x128xf32>
    %108 = arith.mulf %107, %105 : vector<1x128xf32>
    %109 = arith.mulf %102, %75 : vector<1x128xf32>
    %110 = arith.addf %108, %109 : vector<1x128xf32>
    %111 = arith.index_cast %c2_i32 : i32 to index
    %c0_38 = arith.constant 0 : index
    %112 = vector.load %arg7[%111, %c0_38] : memref<8x128xf32, #tpu.memory_space<vmem>>, vector<1x128xf32>
    tpu.vector_store %arg7[%111, %c0_38], %110 {strides = array<i32>} : memref<8x128xf32, #tpu.memory_space<vmem>>, vector<1x128xf32>,
    %c3_i32 = arith.constant 3 : i32
    %113 = arith.truncf %110 : vector<1x128xf32> to vector<1x128xbf16>
    %c0_39 = arith.constant 0 : index
    %c0_40 = arith.constant 0 : index
    %114 = vector.load %arg4[%c0_39, %c0_40] : memref<128x384xbf16, #tpu.memory_space<vmem>>, vector<128x384xbf16>
    %cst_41 = arith.constant dense<0.000000e+00> : vector<1x384xf32>
    %115 = tpu.matmul %113, %114, %cst_41 {dimension_numbers = #tpu.dot_dimension_numbers<[1], [0], [0], [1], [0, 0, 1, 1], [], []>} : vector<1x128xbf16>, vector<128x384xbf16>, vector<1x384xf32> -> vector<1x384xf32>
    %c0_42 = arith.constant 0 : index
    %c0_43 = arith.constant 0 : index
    %116 = vector.load %arg6[%c0_42, %c0_43] : memref<1x384xf32, #tpu.memory_space<vmem>>, vector<1x384xf32>
    %117 = arith.addf %115, %116 : vector<1x384xf32>
    %118 = arith.index_cast %c3_i32 : i32 to index
    %c0_44 = arith.constant 0 : index
    %119 = vector.load %arg8[%118, %c0_44] : memref<8x384xf32, #tpu.memory_space<vmem>>, vector<1x384xf32>
    %120 = vector.extract_strided_slice %119 {offsets = [0, 0], sizes = [1, 128], strides = [1, 1]} : vector<1x384xf32> to vector<1x128xf32>
    %121 = vector.extract_strided_slice %119 {offsets = [0, 128], sizes = [1, 128], strides = [1, 1]} : vector<1x384xf32> to vector<1x128xf32>
    %122 = vector.extract_strided_slice %119 {offsets = [0, 256], sizes = [1, 128], strides = [1, 1]} : vector<1x384xf32> to vector<1x128xf32>
    %123 = vector.extract_strided_slice %117 {offsets = [0, 0], sizes = [1, 128], strides = [1, 1]} : vector<1x384xf32> to vector<1x128xf32>
    %124 = vector.extract_strided_slice %117 {offsets = [0, 128], sizes = [1, 128], strides = [1, 1]} : vector<1x384xf32> to vector<1x128xf32>
    %125 = vector.extract_strided_slice %117 {offsets = [0, 256], sizes = [1, 128], strides = [1, 1]} : vector<1x384xf32> to vector<1x128xf32>
    %126 = arith.addf %120, %123 : vector<1x128xf32>
    %127 = arith.negf %126 : vector<1x128xf32>
    %128 = math.exp %127 : vector<1x128xf32>
    %cst_45 = arith.constant 1.000000e+00 : f32
    %129 = vector.broadcast %cst_45 : f32 to vector<1x128xf32>
    %130 = arith.addf %129, %128 : vector<1x128xf32>
    %131 = arith.divf %129, %130 : vector<1x128xf32>
    %132 = arith.addf %121, %124 : vector<1x128xf32>
    %133 = arith.negf %132 : vector<1x128xf32>
    %134 = math.exp %133 : vector<1x128xf32>
    %cst_46 = arith.constant 1.000000e+00 : f32
    %135 = vector.broadcast %cst_46 : f32 to vector<1x128xf32>
    %136 = arith.addf %135, %134 : vector<1x128xf32>
    %137 = arith.divf %135, %136 : vector<1x128xf32>
    %138 = arith.mulf %131, %125 : vector<1x128xf32>
    %139 = arith.addf %122, %138 : vector<1x128xf32>
    %140 = math.tanh %139 : vector<1x128xf32>
    %cst_47 = arith.constant 1.000000e+00 : f32
    %141 = vector.broadcast %cst_47 : f32 to vector<1x128xf32>
    %142 = arith.subf %141, %137 : vector<1x128xf32>
    %143 = arith.mulf %142, %140 : vector<1x128xf32>
    %144 = arith.mulf %137, %110 : vector<1x128xf32>
    %145 = arith.addf %143, %144 : vector<1x128xf32>
    %146 = arith.index_cast %c3_i32 : i32 to index
    %c0_48 = arith.constant 0 : index
    %147 = vector.load %arg7[%146, %c0_48] : memref<8x128xf32, #tpu.memory_space<vmem>>, vector<1x128xf32>
    tpu.vector_store %arg7[%146, %c0_48], %145 {strides = array<i32>} : memref<8x128xf32, #tpu.memory_space<vmem>>, vector<1x128xf32>,
    %c4_i32 = arith.constant 4 : i32
    %148 = arith.truncf %145 : vector<1x128xf32> to vector<1x128xbf16>
    %c0_49 = arith.constant 0 : index
    %c0_50 = arith.constant 0 : index
    %149 = vector.load %arg4[%c0_49, %c0_50] : memref<128x384xbf16, #tpu.memory_space<vmem>>, vector<128x384xbf16>
    %cst_51 = arith.constant dense<0.000000e+00> : vector<1x384xf32>
    %150 = tpu.matmul %148, %149, %cst_51 {dimension_numbers = #tpu.dot_dimension_numbers<[1], [0], [0], [1], [0, 0, 1, 1], [], []>} : vector<1x128xbf16>, vector<128x384xbf16>, vector<1x384xf32> -> vector<1x384xf32>
    %c0_52 = arith.constant 0 : index
    %c0_53 = arith.constant 0 : index
    %151 = vector.load %arg6[%c0_52, %c0_53] : memref<1x384xf32, #tpu.memory_space<vmem>>, vector<1x384xf32>
    %152 = arith.addf %150, %151 : vector<1x384xf32>
    %153 = arith.index_cast %c4_i32 : i32 to index
    %c0_54 = arith.constant 0 : index
    %154 = vector.load %arg8[%153, %c0_54] : memref<8x384xf32, #tpu.memory_space<vmem>>, vector<1x384xf32>
    %155 = vector.extract_strided_slice %154 {offsets = [0, 0], sizes = [1, 128], strides = [1, 1]} : vector<1x384xf32> to vector<1x128xf32>
    %156 = vector.extract_strided_slice %154 {offsets = [0, 128], sizes = [1, 128], strides = [1, 1]} : vector<1x384xf32> to vector<1x128xf32>
    %157 = vector.extract_strided_slice %154 {offsets = [0, 256], sizes = [1, 128], strides = [1, 1]} : vector<1x384xf32> to vector<1x128xf32>
    %158 = vector.extract_strided_slice %152 {offsets = [0, 0], sizes = [1, 128], strides = [1, 1]} : vector<1x384xf32> to vector<1x128xf32>
    %159 = vector.extract_strided_slice %152 {offsets = [0, 128], sizes = [1, 128], strides = [1, 1]} : vector<1x384xf32> to vector<1x128xf32>
    %160 = vector.extract_strided_slice %152 {offsets = [0, 256], sizes = [1, 128], strides = [1, 1]} : vector<1x384xf32> to vector<1x128xf32>
    %161 = arith.addf %155, %158 : vector<1x128xf32>
    %162 = arith.negf %161 : vector<1x128xf32>
    %163 = math.exp %162 : vector<1x128xf32>
    %cst_55 = arith.constant 1.000000e+00 : f32
    %164 = vector.broadcast %cst_55 : f32 to vector<1x128xf32>
    %165 = arith.addf %164, %163 : vector<1x128xf32>
    %166 = arith.divf %164, %165 : vector<1x128xf32>
    %167 = arith.addf %156, %159 : vector<1x128xf32>
    %168 = arith.negf %167 : vector<1x128xf32>
    %169 = math.exp %168 : vector<1x128xf32>
    %cst_56 = arith.constant 1.000000e+00 : f32
    %170 = vector.broadcast %cst_56 : f32 to vector<1x128xf32>
    %171 = arith.addf %170, %169 : vector<1x128xf32>
    %172 = arith.divf %170, %171 : vector<1x128xf32>
    %173 = arith.mulf %166, %160 : vector<1x128xf32>
    %174 = arith.addf %157, %173 : vector<1x128xf32>
    %175 = math.tanh %174 : vector<1x128xf32>
    %cst_57 = arith.constant 1.000000e+00 : f32
    %176 = vector.broadcast %cst_57 : f32 to vector<1x128xf32>
    %177 = arith.subf %176, %172 : vector<1x128xf32>
    %178 = arith.mulf %177, %175 : vector<1x128xf32>
    %179 = arith.mulf %172, %145 : vector<1x128xf32>
    %180 = arith.addf %178, %179 : vector<1x128xf32>
    %181 = arith.index_cast %c4_i32 : i32 to index
    %c0_58 = arith.constant 0 : index
    %182 = vector.load %arg7[%181, %c0_58] : memref<8x128xf32, #tpu.memory_space<vmem>>, vector<1x128xf32>
    tpu.vector_store %arg7[%181, %c0_58], %180 {strides = array<i32>} : memref<8x128xf32, #tpu.memory_space<vmem>>, vector<1x128xf32>,
    %c5_i32 = arith.constant 5 : i32
    %183 = arith.truncf %180 : vector<1x128xf32> to vector<1x128xbf16>
    %c0_59 = arith.constant 0 : index
    %c0_60 = arith.constant 0 : index
    %184 = vector.load %arg4[%c0_59, %c0_60] : memref<128x384xbf16, #tpu.memory_space<vmem>>, vector<128x384xbf16>
    %cst_61 = arith.constant dense<0.000000e+00> : vector<1x384xf32>
    %185 = tpu.matmul %183, %184, %cst_61 {dimension_numbers = #tpu.dot_dimension_numbers<[1], [0], [0], [1], [0, 0, 1, 1], [], []>} : vector<1x128xbf16>, vector<128x384xbf16>, vector<1x384xf32> -> vector<1x384xf32>
    %c0_62 = arith.constant 0 : index
    %c0_63 = arith.constant 0 : index
    %186 = vector.load %arg6[%c0_62, %c0_63] : memref<1x384xf32, #tpu.memory_space<vmem>>, vector<1x384xf32>
    %187 = arith.addf %185, %186 : vector<1x384xf32>
    %188 = arith.index_cast %c5_i32 : i32 to index
    %c0_64 = arith.constant 0 : index
    %189 = vector.load %arg8[%188, %c0_64] : memref<8x384xf32, #tpu.memory_space<vmem>>, vector<1x384xf32>
    %190 = vector.extract_strided_slice %189 {offsets = [0, 0], sizes = [1, 128], strides = [1, 1]} : vector<1x384xf32> to vector<1x128xf32>
    %191 = vector.extract_strided_slice %189 {offsets = [0, 128], sizes = [1, 128], strides = [1, 1]} : vector<1x384xf32> to vector<1x128xf32>
    %192 = vector.extract_strided_slice %189 {offsets = [0, 256], sizes = [1, 128], strides = [1, 1]} : vector<1x384xf32> to vector<1x128xf32>
    %193 = vector.extract_strided_slice %187 {offsets = [0, 0], sizes = [1, 128], strides = [1, 1]} : vector<1x384xf32> to vector<1x128xf32>
    %194 = vector.extract_strided_slice %187 {offsets = [0, 128], sizes = [1, 128], strides = [1, 1]} : vector<1x384xf32> to vector<1x128xf32>
    %195 = vector.extract_strided_slice %187 {offsets = [0, 256], sizes = [1, 128], strides = [1, 1]} : vector<1x384xf32> to vector<1x128xf32>
    %196 = arith.addf %190, %193 : vector<1x128xf32>
    %197 = arith.negf %196 : vector<1x128xf32>
    %198 = math.exp %197 : vector<1x128xf32>
    %cst_65 = arith.constant 1.000000e+00 : f32
    %199 = vector.broadcast %cst_65 : f32 to vector<1x128xf32>
    %200 = arith.addf %199, %198 : vector<1x128xf32>
    %201 = arith.divf %199, %200 : vector<1x128xf32>
    %202 = arith.addf %191, %194 : vector<1x128xf32>
    %203 = arith.negf %202 : vector<1x128xf32>
    %204 = math.exp %203 : vector<1x128xf32>
    %cst_66 = arith.constant 1.000000e+00 : f32
    %205 = vector.broadcast %cst_66 : f32 to vector<1x128xf32>
    %206 = arith.addf %205, %204 : vector<1x128xf32>
    %207 = arith.divf %205, %206 : vector<1x128xf32>
    %208 = arith.mulf %201, %195 : vector<1x128xf32>
    %209 = arith.addf %192, %208 : vector<1x128xf32>
    %210 = math.tanh %209 : vector<1x128xf32>
    %cst_67 = arith.constant 1.000000e+00 : f32
    %211 = vector.broadcast %cst_67 : f32 to vector<1x128xf32>
    %212 = arith.subf %211, %207 : vector<1x128xf32>
    %213 = arith.mulf %212, %210 : vector<1x128xf32>
    %214 = arith.mulf %207, %180 : vector<1x128xf32>
    %215 = arith.addf %213, %214 : vector<1x128xf32>
    %216 = arith.index_cast %c5_i32 : i32 to index
    %c0_68 = arith.constant 0 : index
    %217 = vector.load %arg7[%216, %c0_68] : memref<8x128xf32, #tpu.memory_space<vmem>>, vector<1x128xf32>
    tpu.vector_store %arg7[%216, %c0_68], %215 {strides = array<i32>} : memref<8x128xf32, #tpu.memory_space<vmem>>, vector<1x128xf32>,
    %c6_i32 = arith.constant 6 : i32
    %218 = arith.truncf %215 : vector<1x128xf32> to vector<1x128xbf16>
    %c0_69 = arith.constant 0 : index
    %c0_70 = arith.constant 0 : index
    %219 = vector.load %arg4[%c0_69, %c0_70] : memref<128x384xbf16, #tpu.memory_space<vmem>>, vector<128x384xbf16>
    %cst_71 = arith.constant dense<0.000000e+00> : vector<1x384xf32>
    %220 = tpu.matmul %218, %219, %cst_71 {dimension_numbers = #tpu.dot_dimension_numbers<[1], [0], [0], [1], [0, 0, 1, 1], [], []>} : vector<1x128xbf16>, vector<128x384xbf16>, vector<1x384xf32> -> vector<1x384xf32>
    %c0_72 = arith.constant 0 : index
    %c0_73 = arith.constant 0 : index
    %221 = vector.load %arg6[%c0_72, %c0_73] : memref<1x384xf32, #tpu.memory_space<vmem>>, vector<1x384xf32>
    %222 = arith.addf %220, %221 : vector<1x384xf32>
    %223 = arith.index_cast %c6_i32 : i32 to index
    %c0_74 = arith.constant 0 : index
    %224 = vector.load %arg8[%223, %c0_74] : memref<8x384xf32, #tpu.memory_space<vmem>>, vector<1x384xf32>
    %225 = vector.extract_strided_slice %224 {offsets = [0, 0], sizes = [1, 128], strides = [1, 1]} : vector<1x384xf32> to vector<1x128xf32>
    %226 = vector.extract_strided_slice %224 {offsets = [0, 128], sizes = [1, 128], strides = [1, 1]} : vector<1x384xf32> to vector<1x128xf32>
    %227 = vector.extract_strided_slice %224 {offsets = [0, 256], sizes = [1, 128], strides = [1, 1]} : vector<1x384xf32> to vector<1x128xf32>
    %228 = vector.extract_strided_slice %222 {offsets = [0, 0], sizes = [1, 128], strides = [1, 1]} : vector<1x384xf32> to vector<1x128xf32>
    %229 = vector.extract_strided_slice %222 {offsets = [0, 128], sizes = [1, 128], strides = [1, 1]} : vector<1x384xf32> to vector<1x128xf32>
    %230 = vector.extract_strided_slice %222 {offsets = [0, 256], sizes = [1, 128], strides = [1, 1]} : vector<1x384xf32> to vector<1x128xf32>
    %231 = arith.addf %225, %228 : vector<1x128xf32>
    %232 = arith.negf %231 : vector<1x128xf32>
    %233 = math.exp %232 : vector<1x128xf32>
    %cst_75 = arith.constant 1.000000e+00 : f32
    %234 = vector.broadcast %cst_75 : f32 to vector<1x128xf32>
    %235 = arith.addf %234, %233 : vector<1x128xf32>
    %236 = arith.divf %234, %235 : vector<1x128xf32>
    %237 = arith.addf %226, %229 : vector<1x128xf32>
    %238 = arith.negf %237 : vector<1x128xf32>
    %239 = math.exp %238 : vector<1x128xf32>
    %cst_76 = arith.constant 1.000000e+00 : f32
    %240 = vector.broadcast %cst_76 : f32 to vector<1x128xf32>
    %241 = arith.addf %240, %239 : vector<1x128xf32>
    %242 = arith.divf %240, %241 : vector<1x128xf32>
    %243 = arith.mulf %236, %230 : vector<1x128xf32>
    %244 = arith.addf %227, %243 : vector<1x128xf32>
    %245 = math.tanh %244 : vector<1x128xf32>
    %cst_77 = arith.constant 1.000000e+00 : f32
    %246 = vector.broadcast %cst_77 : f32 to vector<1x128xf32>
    %247 = arith.subf %246, %242 : vector<1x128xf32>
    %248 = arith.mulf %247, %245 : vector<1x128xf32>
    %249 = arith.mulf %242, %215 : vector<1x128xf32>
    %250 = arith.addf %248, %249 : vector<1x128xf32>
    %251 = arith.index_cast %c6_i32 : i32 to index
    %c0_78 = arith.constant 0 : index
    %252 = vector.load %arg7[%251, %c0_78] : memref<8x128xf32, #tpu.memory_space<vmem>>, vector<1x128xf32>
    tpu.vector_store %arg7[%251, %c0_78], %250 {strides = array<i32>} : memref<8x128xf32, #tpu.memory_space<vmem>>, vector<1x128xf32>,
    %c7_i32 = arith.constant 7 : i32
    %253 = arith.truncf %250 : vector<1x128xf32> to vector<1x128xbf16>
    %c0_79 = arith.constant 0 : index
    %c0_80 = arith.constant 0 : index
    %254 = vector.load %arg4[%c0_79, %c0_80] : memref<128x384xbf16, #tpu.memory_space<vmem>>, vector<128x384xbf16>
    %cst_81 = arith.constant dense<0.000000e+00> : vector<1x384xf32>
    %255 = tpu.matmul %253, %254, %cst_81 {dimension_numbers = #tpu.dot_dimension_numbers<[1], [0], [0], [1], [0, 0, 1, 1], [], []>} : vector<1x128xbf16>, vector<128x384xbf16>, vector<1x384xf32> -> vector<1x384xf32>
    %c0_82 = arith.constant 0 : index
    %c0_83 = arith.constant 0 : index
    %256 = vector.load %arg6[%c0_82, %c0_83] : memref<1x384xf32, #tpu.memory_space<vmem>>, vector<1x384xf32>
    %257 = arith.addf %255, %256 : vector<1x384xf32>
    %258 = arith.index_cast %c7_i32 : i32 to index
    %c0_84 = arith.constant 0 : index
    %259 = vector.load %arg8[%258, %c0_84] : memref<8x384xf32, #tpu.memory_space<vmem>>, vector<1x384xf32>
    %260 = vector.extract_strided_slice %259 {offsets = [0, 0], sizes = [1, 128], strides = [1, 1]} : vector<1x384xf32> to vector<1x128xf32>
    %261 = vector.extract_strided_slice %259 {offsets = [0, 128], sizes = [1, 128], strides = [1, 1]} : vector<1x384xf32> to vector<1x128xf32>
    %262 = vector.extract_strided_slice %259 {offsets = [0, 256], sizes = [1, 128], strides = [1, 1]} : vector<1x384xf32> to vector<1x128xf32>
    %263 = vector.extract_strided_slice %257 {offsets = [0, 0], sizes = [1, 128], strides = [1, 1]} : vector<1x384xf32> to vector<1x128xf32>
    %264 = vector.extract_strided_slice %257 {offsets = [0, 128], sizes = [1, 128], strides = [1, 1]} : vector<1x384xf32> to vector<1x128xf32>
    %265 = vector.extract_strided_slice %257 {offsets = [0, 256], sizes = [1, 128], strides = [1, 1]} : vector<1x384xf32> to vector<1x128xf32>
    %266 = arith.addf %260, %263 : vector<1x128xf32>
    %267 = arith.negf %266 : vector<1x128xf32>
    %268 = math.exp %267 : vector<1x128xf32>
    %cst_85 = arith.constant 1.000000e+00 : f32
    %269 = vector.broadcast %cst_85 : f32 to vector<1x128xf32>
    %270 = arith.addf %269, %268 : vector<1x128xf32>
    %271 = arith.divf %269, %270 : vector<1x128xf32>
    %272 = arith.addf %261, %264 : vector<1x128xf32>
    %273 = arith.negf %272 : vector<1x128xf32>
    %274 = math.exp %273 : vector<1x128xf32>
    %cst_86 = arith.constant 1.000000e+00 : f32
    %275 = vector.broadcast %cst_86 : f32 to vector<1x128xf32>
    %276 = arith.addf %275, %274 : vector<1x128xf32>
    %277 = arith.divf %275, %276 : vector<1x128xf32>
    %278 = arith.mulf %271, %265 : vector<1x128xf32>
    %279 = arith.addf %262, %278 : vector<1x128xf32>
    %280 = math.tanh %279 : vector<1x128xf32>
    %cst_87 = arith.constant 1.000000e+00 : f32
    %281 = vector.broadcast %cst_87 : f32 to vector<1x128xf32>
    %282 = arith.subf %281, %277 : vector<1x128xf32>
    %283 = arith.mulf %282, %280 : vector<1x128xf32>
    %284 = arith.mulf %277, %250 : vector<1x128xf32>
    %285 = arith.addf %283, %284 : vector<1x128xf32>
    %286 = arith.index_cast %c7_i32 : i32 to index
    %c0_88 = arith.constant 0 : index
    %287 = vector.load %arg7[%286, %c0_88] : memref<8x128xf32, #tpu.memory_space<vmem>>, vector<1x128xf32>
    tpu.vector_store %arg7[%286, %c0_88], %285 {strides = array<i32>} : memref<8x128xf32, #tpu.memory_space<vmem>>, vector<1x128xf32>,
    %c8_i32 = arith.constant 8 : i32
    return
  }
  func.func @transform_0(%arg0: i32) -> (i32, i32) {
    %c0_i32 = arith.constant 0 : i32
    %c0_i32_0 = arith.constant 0 : i32
    %c0_i32_1 = arith.constant 0 : i32
    return %c0_i32, %c0_i32_0 : i32, i32
  }
  func.func @transform_1(%arg0: i32) -> (i32, i32) {
    %c0_i32 = arith.constant 0 : i32
    %c0_i32_0 = arith.constant 0 : i32
    %c0_i32_1 = arith.constant 0 : i32
    return %c0_i32, %c0_i32_0 : i32, i32
  }
  func.func @transform_2(%arg0: i32) -> (i32, i32) {
    %c0_i32 = arith.constant 0 : i32
    %c0_i32_0 = arith.constant 0 : i32
    %c0_i32_1 = arith.constant 0 : i32
    return %c0_i32, %c0_i32_0 : i32, i32
  }
  func.func @transform_3(%arg0: i32) -> (i32, i32) {
    %c0_i32 = arith.constant 0 : i32
    %c0_i32_0 = arith.constant 0 : i32
    %c0_i32_1 = arith.constant 0 : i32
    return %c0_i32, %c0_i32_0 : i32, i32
  }
  func.func @transform_4(%arg0: i32) -> (i32, i32) {
    %c0_i32 = arith.constant 0 : i32
    %c0_i32_0 = arith.constant 0 : i32
    %c0_i32_1 = arith.constant 0 : i32
    return %c0_i32, %c0_i32_0 : i32, i32
  }
  func.func @transform_5(%arg0: i32) -> (i32, i32) {
    %c0_i32 = arith.constant 0 : i32
    %c0_i32_0 = arith.constant 0 : i32
    %c0_i32_1 = arith.constant 0 : i32
    return %c0_i32, %c0_i32_0 : i32, i32
  }
  func.func @transform_6(%arg0: i32) -> (i32, i32) {
    %c0_i32 = arith.constant 0 : i32
    %c0_i32_0 = arith.constant 0 : i32
    %c0_i32_1 = arith.constant 0 : i32
    return %c0_i32, %c0_i32_0 : i32, i32
  }
}

</mosaic_0001>

<bundles_post_ra>
// kernel: tpu_custom_call.1
= control target key start
LH: loop header
LB: loop body
LE: loop exit
PB: predicated region body
PF: predicated region fallthrough
CT: control target
= control target key end

     0   :  { %11 = vsyncpa [#allocation4], 0  ;;  %s3959_s0 = inlined_call_operand.hbm [shape: bf16[8,128], index: 0, kind: input, shape index: {}]   ;;  %s3960_s1 = inlined_call_operand.vmem [shape: f32[1,128], index: 1, kind: input, shape index: {}]   ;;  %s3961_s2 = inlined_call_operand.hbm [shape: bf16[128,384], index: 2, kind: input, shape index: {}]   ;;  %s3962_s3 = inlined_call_operand.hbm [shape: bf16[128,384], index: 3, kind: input, shape index: {}]   ;;  %s3963_s4 = inlined_call_operand.vmem [shape: f32[1,384], index: 4, kind: input, shape index: {}]   ;;  %s3964_s5 = inlined_call_operand.vmem [shape: f32[1,384], index: 5, kind: input, shape index: {}]   ;;  %s3965_s6 = inlined_call_operand.hbm [shape: f32[8,128], index: 6, kind: output, shape index: {}]  }
   0x1   :  { %12 = vsyncpa [#allocation7], 0 }
   0x2   :  { %13 = vsyncpa [#allocation5], 0  ;;  %s3466_s21 = smov [#allocation6]   ;;  %s3372_s25 = scalar_lea.hbm %s3961_s2, 3072 }
   0x3   :  { %s31_s22 = sshll.u32 %s3466_s21, 4  ;;  %p3373_p0 = scmp.ne.s32.totalorder %s3961_s2, %s3372_s25  ;;  %s32_s22 = int_to_ptr.vmem [resolvable:$true] %s31_s22 }
   0x4   :  { %p3376_p1 = scmp.lt.u32.totalorder %s3372_s25, %s3961_s2 }
   0x6   :  { %p3378_p2 = pnand %p3376_p1, %p3373_p0 }
   0x8   :  { %3381 = shalt.err (!%p3378_p2)
}
   0x9   :  { %s3382_s30 = scalar_lea.vmem %s32_s22, 3072  ;;  %p3387_p4 = scmp.lt.s32.totalorder %s32_s22, %s32_s22 }
   0xa   :  { %p3383_p3 = scmp.ne.s32.totalorder %s32_s22, %s3382_s30  ;;  %p3388_p5 = scmp.lt.s32.totalorder %s3382_s30, %s3382_s30 }
   0xc   :  { %p3389_p6 = por %p3388_p5, %p3387_p4 }
   0xe   :  { %p3390_p7 = pnand %p3389_p6, %p3383_p3 }
  0x10   :  { %3393 = shalt.err (!%p3390_p7)
}
  0x11   :  { %s3467_s7 = smov 192   ;;  %s3468_s8 = smov 12  }
  0x12   :  { %37 = dma.hbm_to_vmem [thread:$0]  %s3961_s2, 3072, %s32_s22, [#allocation7], %s3467_s7, %s3467_s7, %s3468_s8  }
  0x13   :  { %s3469_s11 = smov [#allocation3]   ;;  %s3470_s13 = smov [#allocation8]  }
  0x14   :  { %s20_s12 = sshll.u32 %s3469_s11, 4  ;;  %s43_s14 = sshll.u32 %s3470_s13, 4  ;;  %s21_s12 = int_to_ptr.vmem [resolvable:$true] %s20_s12  ;;  %s44_s14 = int_to_ptr.vmem [resolvable:$true] %s43_s14 }
  0x15   :  { %s3394_s17 = scalar_lea.hbm %s3959_s0, 64 }
  0x16   :  { %p3395_p8 = scmp.ne.s32.totalorder %s3959_s0, %s3394_s17  ;;  %p3398_p9 = scmp.lt.u32.totalorder %s3394_s17, %s3959_s0 }
  0x18   :  { %p3400_p10 = pnand %p3398_p9, %p3395_p8 }
  0x1a   :  { %3403 = shalt.err (!%p3400_p10)
}
  0x1b   :  { %s3404_s2 = scalar_lea.vmem %s21_s12, 64  ;;  %p3409_p12 = scmp.lt.s32.totalorder %s21_s12, %s21_s12 }
  0x1c   :  { %p3405_p11 = scmp.ne.s32.totalorder %s21_s12, %s3404_s2  ;;  %p3410_p13 = scmp.lt.s32.totalorder %s3404_s2, %s3404_s2 }
  0x1e   :  { %p3411_p0 = por %p3410_p13, %p3409_p12 }
  0x20   :  { %p3412_p1 = pnand %p3411_p0, %p3405_p11 }
  0x22   :  { %3415 = shalt.err (!%p3412_p1)
}
  0x23   :  { %23 = dma.hbm_to_vmem [thread:$0]  %s3959_s0, 64, %s21_s12, [#allocation4]  }
  0x24   :  { %s3416_s26 = scalar_lea.hbm %s3962_s3, 3072 }
  0x25   :  { %p3417_p2 = scmp.ne.s32.totalorder %s3962_s3, %s3416_s26  ;;  %p3420_p3 = scmp.lt.u32.totalorder %s3416_s26, %s3962_s3 }
  0x27   :  { %p3422_p4 = pnand %p3420_p3, %p3417_p2 }
  0x29   :  { %3425 = shalt.err (!%p3422_p4)
}
  0x2a   :  { %s3426_s9 = scalar_lea.vmem %s44_s14, 3072  ;;  %p3431_p6 = scmp.lt.s32.totalorder %s44_s14, %s44_s14 }
  0x2b   :  { %p3427_p5 = scmp.ne.s32.totalorder %s44_s14, %s3426_s9  ;;  %p3432_p7 = scmp.lt.s32.totalorder %s3426_s9, %s3426_s9 }
  0x2d   :  { %p3433_p8 = por %p3432_p7, %p3431_p6 }
  0x2f   :  { %p3434_p9 = pnand %p3433_p8, %p3427_p5 }
  0x31   :  { %3437 = shalt.err (!%p3434_p9)
}
  0x32   :  { %49 = dma.hbm_to_vmem [thread:$0]  %s3962_s3, 3072, %s44_s14, [#allocation7], %s3467_s7, %s3467_s7, %s3468_s8  }
  0x33   :  { %3460 = dma.done.wait [#allocation4], 64  }
  0x34   :  { %3461 = vsyncadd [#allocation4], 4294967232 }
  0x35   :  { %3462 = dma.done.wait [#allocation7], 6144  }
  0x36   :  { %3463 = vsyncadd [#allocation7], 4294961152  ;;  %v3471_v0 = vmov 0.0   ;;  %v3472_v1 = vmov 0   ;;  %vm3473_vm0 = vmmov 0   ;;  %v99_v61 = vlaneseq }
  0x37   :  { %2959 = vmatprep.subr.bf16.mxu1 %v3471_v0  ;;  %274 = vmatprep.mubr.bf16.mxu0 %v3472_v1  ;;  %v3148_v2 = vld [vmem:[#allocation6 + $0x4] ss:$12 sps:$4 sm:$0xff]   ;;  %v3150_v3 = vld [vmem:[#allocation6] ss:$12 sps:$4 sm:$0xff]   ;;  %v3151_v4 = vld [vmem:[#allocation6 + $0x8] ss:$12 sps:$4 sm:$0xff]  }
  0x38   :  { %2975 = vmatprep.mubr.msk.bf16.mxu1 %vm3473_vm0, %v3471_v0  ;;  %242 = vmatprep.subr.bf16.mxu0 %v3148_v2  ;;  %v3152_v5 = vld [vmem:[#allocation6 + $0x1c] ss:$12 sps:$4 sm:$0xff]   ;;  %v3154_v6 = vld [vmem:[#allocation6 + $0x18] ss:$12 sps:$4 sm:$0xff]   ;;  %v3155_v7 = vld [vmem:[#allocation6 + $0x20] ss:$12 sps:$4 sm:$0xff]  }
  0x39   :  { %243 = vmatpush1.bf16.msra.mxu0 %v3150_v3  ;;  %2960 = vmatpush3.bf16.msra.mxu1 %v3151_v4  ;;  %v3156_v8 = vld [vmem:[#allocation6 + $0x34] ss:$12 sps:$4 sm:$0xff]   ;;  %v3158_v9 = vld [vmem:[#allocation6 + $0x30] ss:$12 sps:$4 sm:$0xff]   ;;  %v3159_v10 = vld [vmem:[#allocation6 + $0x38] ss:$12 sps:$4 sm:$0xff]  }
  0x3a   :  { %244 = vmatprep.subr.bf16.mxu0 %v3152_v5  ;;  %2961 = vmatprep.subr.bf16.mxu1 %v3471_v0  ;;  %v3160_v11 = vld [vmem:[#allocation6 + $0x4c] ss:$12 sps:$4 sm:$0xff]   ;;  %v3162_v12 = vld [vmem:[#allocation6 + $0x48] ss:$12 sps:$4 sm:$0xff]   ;;  %v3163_v13 = vld [vmem:[#allocation6 + $0x50] ss:$12 sps:$4 sm:$0xff]  }
  0x3b   :  { %v3164_v14 = vld [vmem:[#allocation6 + $0x64] ss:$12 sps:$4 sm:$0xff]   ;;  %v3166_v15 = vld [vmem:[#allocation6 + $0x60] ss:$12 sps:$4 sm:$0xff]   ;;  %v3167_v16 = vld [vmem:[#allocation6 + $0x68] ss:$12 sps:$4 sm:$0xff]  }
  0x3c   :  { %v3168_v17 = vld [vmem:[#allocation6 + $0x7c] ss:$12 sps:$4 sm:$0xff]   ;;  %v3170_v18 = vld [vmem:[#allocation6 + $0x78] ss:$12 sps:$4 sm:$0xff]   ;;  %v3171_v19 = vld [vmem:[#allocation6 + $0x80] ss:$12 sps:$4 sm:$0xff]  }
  0x3d   :  { %245 = vmatpush1.bf16.msra.mxu0 %v3154_v6  ;;  %2962 = vmatpush3.bf16.msra.mxu1 %v3155_v7  ;;  %v3172_v20 = vld [vmem:[#allocation6 + $0x94] ss:$12 sps:$4 sm:$0xff]   ;;  %v3174_v21 = vld [vmem:[#allocation6 + $0x90] ss:$12 sps:$4 sm:$0xff]   ;;  %v3175_v22 = vld [vmem:[#allocation6 + $0x98] ss:$12 sps:$4 sm:$0xff]  }
  0x3e   :  { %246 = vmatprep.subr.bf16.mxu0 %v3156_v8  ;;  %2963 = vmatprep.subr.bf16.mxu1 %v3471_v0  ;;  %v3176_v23 = vld [vmem:[#allocation6 + $0xac] ss:$12 sps:$4 sm:$0xff]   ;;  %v3178_v24 = vld [vmem:[#allocation6 + $0xa8] ss:$12 sps:$4 sm:$0xff]   ;;  %v3179_v25 = vld [vmem:[#allocation6 + $0xb0] ss:$12 sps:$4 sm:$0xff]  }
  0x3f   :  { %v3562_v26 = vld [vmem:[#allocation8 + $0x4] ss:$12 sps:$4 sm:$0xff]   ;;  %v64_v27 = vld [vmem:[#allocation3] sm:$0xf]  ;;  %v3565_v28 = vld [vmem:[#allocation8] ss:$12 sps:$4 sm:$0xff]  }
  0x40   :  { %v3567_v29 = vld [vmem:[#allocation8 + $0x1c] ss:$12 sps:$4 sm:$0xff]   ;;  %v3571_v31 = vld [vmem:[#allocation8 + $0x18] ss:$12 sps:$4 sm:$0xff]   ;;  %v3574_v32 = vld [vmem:[#allocation8 + $0x34] ss:$12 sps:$4 sm:$0xff]  }
  0x41   :  { %247 = vmatpush1.bf16.msra.mxu0 %v3158_v9  ;;  %2964 = vmatpush3.bf16.msra.mxu1 %v3159_v10  ;;  %v3201_v30 = vld [vmem:[#allocation8 + $0x8] ss:$12 sps:$4 sm:$0xff]   ;;  %v3205_v33 = vld [vmem:[#allocation8 + $0x20] ss:$12 sps:$4 sm:$0xff]   ;;  %v3577_v34 = vld [vmem:[#allocation8 + $0x30] ss:$12 sps:$4 sm:$0xff]  }
  0x42   :  { %248 = vmatprep.subr.bf16.mxu0 %v3160_v11  ;;  %2965 = vmatprep.subr.bf16.mxu1 %v3471_v0  ;;  %v3581_v35 = vld [vmem:[#allocation8 + $0x4c] ss:$12 sps:$4 sm:$0xff]   ;;  %v3587_v37 = vld [vmem:[#allocation8 + $0x48] ss:$12 sps:$4 sm:$0xff]   ;;  %v3590_v38 = vld [vmem:[#allocation8 + $0x64] ss:$12 sps:$4 sm:$0xff]  }
  0x43   :  { %v3206_v36 = vld [vmem:[#allocation8 + $0x38] ss:$12 sps:$4 sm:$0xff]   ;;  %v3207_v39 = vld [vmem:[#allocation8 + $0x50] ss:$12 sps:$4 sm:$0xff]   ;;  %v3594_v40 = vld [vmem:[#allocation8 + $0x60] ss:$12 sps:$4 sm:$0xff]  }
  0x44   :  { %v3597_v41 = vld [vmem:[#allocation8 + $0x7c] ss:$12 sps:$4 sm:$0xff]   ;;  %v3601_v43 = vld [vmem:[#allocation8 + $0x78] ss:$12 sps:$4 sm:$0xff]   ;;  %v3604_v44 = vld [vmem:[#allocation8 + $0x94] ss:$12 sps:$4 sm:$0xff]  }
  0x45   :  { %249 = vmatpush1.bf16.msra.mxu0 %v3162_v12  ;;  %2966 = vmatpush3.bf16.msra.mxu1 %v3163_v13  ;;  %v3208_v42 = vld [vmem:[#allocation8 + $0x68] ss:$12 sps:$4 sm:$0xff]   ;;  %v3209_v45 = vld [vmem:[#allocation8 + $0x80] ss:$12 sps:$4 sm:$0xff]   ;;  %v3608_v46 = vld [vmem:[#allocation8 + $0x90] ss:$12 sps:$4 sm:$0xff]  }
  0x46   :  { %250 = vmatprep.subr.bf16.mxu0 %v3164_v14  ;;  %2967 = vmatprep.subr.bf16.mxu1 %v3471_v0  ;;  %v3611_v47 = vld [vmem:[#allocation8 + $0xac] ss:$12 sps:$4 sm:$0xff]   ;;  %v3615_v49 = vld [vmem:[#allocation8 + $0xa8] ss:$12 sps:$4 sm:$0xff]   ;;  %v3620_v50 = vld [vmem:[%s3960_s1] sm:$0x1] }
  0x47   :  { %v3210_v48 = vld [vmem:[#allocation8 + $0x98] ss:$12 sps:$4 sm:$0xff]   ;;  %v3211_v51 = vld [vmem:[#allocation8 + $0xb0] ss:$12 sps:$4 sm:$0xff]   ;;  %v327_v52 = vpack.c.bf16 %v3620_v50, %v3620_v50  ;;  %v3212_v53 = vld [vmem:[#allocation8 + $0x8] ss:$12 sps:$4 sm:$0xff]  }
  0x48   :  { %v3213_v54 = vld [vmem:[#allocation8 + $0x20] ss:$12 sps:$4 sm:$0xff]   ;;  %v3214_v55 = vld [vmem:[#allocation8 + $0x38] ss:$12 sps:$4 sm:$0xff]   ;;  %v3215_v56 = vld [vmem:[#allocation8 + $0x50] ss:$12 sps:$4 sm:$0xff]  }
  0x49   :  { %251 = vmatpush1.bf16.msra.mxu0 %v3166_v15  ;;  %2968 = vmatpush3.bf16.msra.mxu1 %v3167_v16  ;;  %v3216_v57 = vld [vmem:[#allocation8 + $0x68] ss:$12 sps:$4 sm:$0xff]   ;;  %v3217_v58 = vld [vmem:[#allocation8 + $0x80] ss:$12 sps:$4 sm:$0xff]   ;;  %v3218_v59 = vld [vmem:[#allocation8 + $0x98] ss:$12 sps:$4 sm:$0xff]  }
  0x4a   :  { %252 = vmatprep.subr.bf16.mxu0 %v3168_v17  ;;  %2969 = vmatprep.subr.bf16.mxu1 %v3471_v0  ;;  %v3219_v60 = vld [vmem:[#allocation8 + $0xb0] ss:$12 sps:$4 sm:$0xff]   ;;  %v100_v62 = vshrl.u32 %v99_v61, 7  ;;  %v97_v2 = vld [vmem:[%s3963_s4] sm:$0x7] }
  0x4c   :  { %v3658_v63 = vsub.s32 0, %v100_v62  ;;  %v3663_v3 = vsub.s32 1, %v100_v62  ;;  %v3665_v4 = vsub.s32 2, %v100_v62 }
  0x4d   :  { %253 = vmatpush1.bf16.msra.mxu0 %v3170_v18  ;;  %2970 = vmatpush3.bf16.msra.mxu1 %v3171_v19  ;;  %v360_v19 = vld [vmem:[%s3964_s5] sm:$0x7] }
  0x4e   :  { %254 = vmatprep.subr.bf16.mxu0 %v3172_v20  ;;  %2971 = vmatprep.subr.bf16.mxu1 %v3471_v0  ;;  %v102_v5 = vrot.slane %v97_v2, %v3658_v63  ;;  %v106_v6 = vrot.slane %v97_v2, %v3663_v3  ;;  %v110_v7 = vrot.slane %v97_v2, %v3665_v4 }
  0x4f   :  { %v493_v20 = vrot.slane %v360_v19, %v3658_v63 }
  0x51   :  { %255 = vmatpush1.bf16.msra.mxu0 %v3174_v21  ;;  %2972 = vmatpush3.bf16.msra.mxu1 %v3175_v22  ;;  %v497_v21 = vrot.slane %v360_v19, %v3663_v3 }
  0x52   :  { %256 = vmatprep.subr.bf16.mxu0 %v3176_v23  ;;  %2973 = vmatprep.subr.bf16.mxu1 %v3471_v0 }
  0x55   :  { %257 = vmatpush1.bf16.msra.mxu0 %v3178_v24  ;;  %2974 = vmatpush3.bf16.msra.mxu1 %v3179_v25 }
  0x56   :  { %505 = vmatprep.subr.bf16.mxu0 %v3562_v26  ;;  %2979 = vmatprep.subr.bf16.mxu1 %v3471_v0 }
  0x58   :  { %275 = vmatmul.mubr.bf16.vlgmr.msra.gmra.mrb[0].mxu0 %v64_v27  ;;  %2976 = vmatmul.mubr.bf16.vlgmr.msra.gmra.mrb[0].mxu1 %v64_v27 }
  0x59   :  { %506 = vmatpush1.bf16.msra.mxu0 %v3565_v28  ;;  %2980 = vmatpush3.bf16.msra.mxu1 %v3201_v30 }
  0x5a   :  { %507 = vmatprep.subr.bf16.mxu0 %v3567_v29  ;;  %2981 = vmatprep.subr.bf16.mxu1 %v3471_v0 }
  0x5b   :  { %537 = vmatprep.mubr.bf16.mxu0 %v3472_v1  ;;  %2995 = vmatprep.mubr.msk.bf16.mxu1 %vm3473_vm0, %v3471_v0 }
  0x5d   :  { %508 = vmatpush1.bf16.msra.mxu0 %v3571_v31  ;;  %2982 = vmatpush3.bf16.msra.mxu1 %v3205_v33 }
  0x5e   :  { %509 = vmatprep.subr.bf16.mxu0 %v3574_v32  ;;  %2983 = vmatprep.subr.bf16.mxu1 %v3471_v0 }
  0x61   :  { %510 = vmatpush1.bf16.msra.mxu0 %v3577_v34  ;;  %2984 = vmatpush3.bf16.msra.mxu1 %v3206_v36 }
  0x62   :  { %511 = vmatprep.subr.bf16.mxu0 %v3581_v35  ;;  %2985 = vmatprep.subr.bf16.mxu1 %v3471_v0 }
  0x65   :  { %512 = vmatpush1.bf16.msra.mxu0 %v3587_v37  ;;  %2986 = vmatpush3.bf16.msra.mxu1 %v3207_v39 }
  0x66   :  { %513 = vmatprep.subr.bf16.mxu0 %v3590_v38  ;;  %2987 = vmatprep.subr.bf16.mxu1 %v3471_v0 }
  0x69   :  { %514 = vmatpush1.bf16.msra.mxu0 %v3594_v40  ;;  %2988 = vmatpush3.bf16.msra.mxu1 %v3208_v42 }
  0x6a   :  { %515 = vmatprep.subr.bf16.mxu0 %v3597_v41  ;;  %2989 = vmatprep.subr.bf16.mxu1 %v3471_v0 }
  0x6d   :  { %516 = vmatpush1.bf16.msra.mxu0 %v3601_v43  ;;  %2990 = vmatpush3.bf16.msra.mxu1 %v3209_v45 }
  0x6e   :  { %517 = vmatprep.subr.bf16.mxu0 %v3604_v44  ;;  %2991 = vmatprep.subr.bf16.mxu1 %v3471_v0 }
  0x71   :  { %518 = vmatpush1.bf16.msra.mxu0 %v3608_v46  ;;  %2992 = vmatpush3.bf16.msra.mxu1 %v3210_v48 }
  0x72   :  { %519 = vmatprep.subr.bf16.mxu0 %v3611_v47  ;;  %2993 = vmatprep.subr.bf16.mxu1 %v3471_v0 }
  0x75   :  { %520 = vmatpush1.bf16.msra.mxu0 %v3615_v49  ;;  %2994 = vmatpush3.bf16.msra.mxu1 %v3211_v51 }
  0x76   :  { %792 = vmatprep.subr.bf16.mxu0 %v3562_v26  ;;  %2999 = vmatprep.subr.bf16.mxu1 %v3471_v0 }
  0x78   :  { %538 = vmatmul.mubr.bf16.vlgmr.msra.gmra.mrb[4].mxu0 %v327_v52  ;;  %2996 = vmatmul.mubr.bf16.vlgmr.msra.gmra.mrb[4].mxu1 %v327_v52 }
  0x79   :  { %793 = vmatpush1.bf16.msra.mxu0 %v3565_v28  ;;  %824 = vmatprep.mubr.bf16.mxu0 %v3472_v1 }
  0x7a   :  { %794 = vmatprep.subr.bf16.mxu0 %v3567_v29  ;;  %3015 = vmatprep.mubr.msk.bf16.mxu1 %vm3473_vm0, %v3471_v0 }
  0x7b   :  { %3000 = vmatpush3.bf16.msra.mxu1 %v3212_v53 }
  0x7c   :  { %3001 = vmatprep.subr.bf16.mxu1 %v3471_v0 }
  0x7d   :  { %795 = vmatpush1.bf16.msra.mxu0 %v3571_v31 }
  0x7e   :  { %796 = vmatprep.subr.bf16.mxu0 %v3574_v32 }
  0x7f   :  { %3002 = vmatpush3.bf16.msra.mxu1 %v3213_v54 }
  0x80   :  { %3003 = vmatprep.subr.bf16.mxu1 %v3471_v0 }
  0x81   :  { %797 = vmatpush1.bf16.msra.mxu0 %v3577_v34 }
  0x82   :  { %798 = vmatprep.subr.bf16.mxu0 %v3581_v35 }
  0x83   :  { %3004 = vmatpush3.bf16.msra.mxu1 %v3214_v55 }
  0x84   :  { %3005 = vmatprep.subr.bf16.mxu1 %v3471_v0 }
  0x85   :  { %799 = vmatpush1.bf16.msra.mxu0 %v3587_v37 }
  0x86   :  { %800 = vmatprep.subr.bf16.mxu0 %v3590_v38 }
  0x87   :  { %3006 = vmatpush3.bf16.msra.mxu1 %v3215_v56 }
  0x88   :  { %3007 = vmatprep.subr.bf16.mxu1 %v3471_v0 }
  0x89   :  { %801 = vmatpush1.bf16.msra.mxu0 %v3594_v40 }
  0x8a   :  { %802 = vmatprep.subr.bf16.mxu0 %v3597_v41 }
  0x8b   :  { %3008 = vmatpush3.bf16.msra.mxu1 %v3216_v57  ;;  %v501_v57 = vrot.slane %v360_v19, %v3665_v4  ;;  %v647_v19 = vld [vmem:[%s3964_s5] sm:$0x7] }
  0x8c   :  { %3009 = vmatprep.subr.bf16.mxu1 %v3471_v0 }
  0x8d   :  { %803 = vmatpush1.bf16.msra.mxu0 %v3601_v43 }
  0x8e   :  { %804 = vmatprep.subr.bf16.mxu0 %v3604_v44 }
  0x8f   :  { %3010 = vmatpush3.bf16.msra.mxu1 %v3217_v58 }
  0x90   :  { %3011 = vmatprep.subr.bf16.mxu1 %v3471_v0 }
  0x91   :  { %805 = vmatpush1.bf16.msra.mxu0 %v3608_v46 }
  0x92   :  { %806 = vmatprep.subr.bf16.mxu0 %v3611_v47 }
  0x93   :  { %3012 = vmatpush3.bf16.msra.mxu1 %v3218_v59 }
  0x94   :  { %3013 = vmatprep.subr.bf16.mxu1 %v3471_v0 }
  0x95   :  { %807 = vmatpush1.bf16.msra.mxu0 %v3615_v49 }
  0x96   :  { %1080 = vmatprep.subr.bf16.mxu0 %v3562_v26 }
  0x97   :  { %3014 = vmatpush3.bf16.msra.mxu1 %v3219_v60 }
  0x98   :  { %3019 = vmatprep.subr.bf16.mxu1 %v3471_v0 }
 0x12b   :  { %v276_v8 = vpop.f32.mrb[0].mxu0  ;;  %v317_v11 = vpop.f32.mrb[0].mxu1 }
 0x12c   :  { %v277_v9 = vadd.f32 %v276_v8, %v102_v5  ;;  %v278_v10 = vpop.f32.mrb[1].mxu0  ;;  %v318_v13 = vadd.f32 %v317_v11, %v110_v7  ;;  %v2977_v15 = vpop.f32.mrb[1].mxu1 }
 0x12d   :  { %v279_v12 = vadd.f32 %v278_v10, %v106_v6  ;;  %v280_v14 = vpop.f32.mrb[2].mxu0  ;;  %v320_v17 = vpop.f32.mrb[2].mxu1  ;;  %v3223_v15 = vld [vmem:[#allocation8 + $0x50] ss:$12 sps:$4 sm:$0xff]  }
 0x12e   :  { %323 = vst [vmem:[#allocation2] sm:$0xff] %v277_v9  ;;  %v281_v16 = vpop.f32.mrb[3].mxu0  ;;  %325 = vst [vmem:[#allocation2 + $0x10] sm:$0xff] %v318_v13  ;;  %v2978_v18 = vpop.f32.mrb[3].mxu1  ;;  %v3221_v13 = vld [vmem:[#allocation8 + $0x20] ss:$12 sps:$4 sm:$0xff]  }
 0x12f   :  { %324 = vst [vmem:[#allocation2 + $0x8] sm:$0xff] %v279_v12  ;;  %v3222_v14 = vld [vmem:[#allocation8 + $0x38] ss:$12 sps:$4 sm:$0xff]   ;;  %v3224_v16 = vld [vmem:[#allocation8 + $0x68] ss:$12 sps:$4 sm:$0xff]  }
 0x130   :  { %v3225_v17 = vld [vmem:[#allocation8 + $0x80] ss:$12 sps:$4 sm:$0xff]   ;;  %v3227_v18 = vld [vmem:[#allocation8 + $0xb0] ss:$12 sps:$4 sm:$0xff]  }
 0x136   :  { %v586_v24 = vld [vmem:[#allocation2] ss:$8 sm:$0x7] }
 0x137   :  { %v595_v48 = vrot.slane %v586_v24, 1  ;;  %v605_v2 = vrot.slane %v586_v24, 2 }
 0x14b   :  { %v539_v22 = vpop.f32.mrb[4].mxu0  ;;  %v580_v27 = vpop.f32.mrb[4].mxu1 }
 0x14c   :  { %v540_v23 = vadd.f32 %v539_v22, %v493_v20  ;;  %v541_v25 = vpop.f32.mrb[5].mxu0  ;;  %v2997_v36 = vpop.f32.mrb[5].mxu1  ;;  %v581_v60 = vadd.f32 %v580_v27, %v501_v57  ;;  %v780_v20 = vrot.slane %v647_v19, %v3658_v63 }
 0x14d   :  { %v542_v30 = vadd.f32 %v541_v25, %v497_v21  ;;  %v543_v33 = vpop.f32.mrb[6].mxu0  ;;  %v583_v45 = vpop.f32.mrb[6].mxu1  ;;  %v784_v21 = vrot.slane %v647_v19, %v3663_v3  ;;  %v874_v25 = vld [vmem:[#allocation2 + $0x1] ss:$8 sm:$0x7] }
 0x14e   :  { %v587_v39 = vadd.f32 %v586_v24, %v540_v23  ;;  %v544_v42 = vpop.f32.mrb[7].mxu0  ;;  %v2998_v51 = vpop.f32.mrb[7].mxu1 }
 0x14f   :  { %v597_v53 = vadd.f32 %v595_v48, %v542_v30  ;;  %v883_v51 = vrot.slane %v874_v25, 1 }
 0x150   :  { %v2694_v52 = vmul.f32 -1.442695, %v587_v39 }
 0x151   :  { %v2695_v54 = vmul.f32 -1.442695, %v597_v53 }
 0x152   :  { %3292 = vpow2.f32 %v2694_v52 }
 0x153   :  { %3294 = vpow2.f32 %v2695_v54 }
 0x15c   :  { %v3293_v55 = vpop.eup %3292 }
 0x15d   :  { %v591_v56 = vadd.f32 1.0, %v3293_v55  ;;  %v3295_v58 = vpop.eup %3294 }
 0x15e   :  { %v601_v59 = vadd.f32 1.0, %v3295_v58  ;;  %v788_v58 = vrot.slane %v647_v19, %v3665_v4 }
 0x15f   :  { %3296 = vrcp.f32 %v591_v56 }
 0x160   :  { %3298 = vrcp.f32 %v601_v59 }
 0x169   :  { %v3297_v61 = vpop.eup %3296 }
 0x16a   :  { %v604_v62 = vmul.f32 %v3297_v61, %v581_v60  ;;  %v3299_v6 = vpop.eup %3298 }
 0x16b   :  { %v609_v7 = vsub.f32 1.0, %v3299_v6  ;;  %v611_v10 = vmul.f32 %v3299_v6, %v3620_v50  ;;  %v3220_v50 = vld [vmem:[#allocation8 + $0x8] ss:$12 sps:$4 sm:$0xff]  }
 0x16c   :  { %v607_v5 = vadd.f32 %v605_v2, %v604_v62  ;;  %v893_v2 = vrot.slane %v874_v25, 2 }
 0x16e   :  { %3300 = vtanh.f32 %v607_v5 }
 0x178   :  { %v3301_v8 = vpop.eup %3300 }
 0x179   :  { %v610_v9 = vmul.f32 %v3301_v8, %v609_v7 }
 0x17b   :  { %v3677_v11 = vadd.f32 %v611_v10, %v610_v9 }
 0x17d   :  { %613 = vst [vmem:[#allocation9] sm:$0x1] %v3677_v11  ;;  %v614_v12 = vpack.c.bf16 %v3677_v11, %v3677_v11 }
 0x17f   :  { %825 = vmatmul.mubr.bf16.vlgmr.msra.gmra.mrb[8].mxu0 %v614_v12  ;;  %3016 = vmatmul.mubr.bf16.vlgmr.msra.gmra.mrb[8].mxu1 %v614_v12 }
 0x180   :  { %1081 = vmatpush1.bf16.msra.mxu0 %v3565_v28  ;;  %1112 = vmatprep.mubr.bf16.mxu0 %v3472_v1 }
 0x181   :  { %1082 = vmatprep.subr.bf16.mxu0 %v3567_v29  ;;  %3035 = vmatprep.mubr.msk.bf16.mxu1 %vm3473_vm0, %v3471_v0 }
 0x182   :  { %3020 = vmatpush3.bf16.msra.mxu1 %v3220_v50 }
 0x183   :  { %3021 = vmatprep.subr.bf16.mxu1 %v3471_v0 }
 0x184   :  { %1083 = vmatpush1.bf16.msra.mxu0 %v3571_v31 }
 0x185   :  { %1084 = vmatprep.subr.bf16.mxu0 %v3574_v32 }
 0x186   :  { %3022 = vmatpush3.bf16.msra.mxu1 %v3221_v13 }
 0x187   :  { %3023 = vmatprep.subr.bf16.mxu1 %v3471_v0 }
 0x188   :  { %1085 = vmatpush1.bf16.msra.mxu0 %v3577_v34 }
 0x189   :  { %1086 = vmatprep.subr.bf16.mxu0 %v3581_v35 }
 0x18a   :  { %3024 = vmatpush3.bf16.msra.mxu1 %v3222_v14 }
 0x18b   :  { %3025 = vmatprep.subr.bf16.mxu1 %v3471_v0 }
 0x18c   :  { %1087 = vmatpush1.bf16.msra.mxu0 %v3587_v37 }
 0x18d   :  { %1088 = vmatprep.subr.bf16.mxu0 %v3590_v38 }
 0x18e   :  { %3026 = vmatpush3.bf16.msra.mxu1 %v3223_v15 }
 0x18f   :  { %3027 = vmatprep.subr.bf16.mxu1 %v3471_v0 }
 0x190   :  { %1089 = vmatpush1.bf16.msra.mxu0 %v3594_v40 }
 0x191   :  { %1090 = vmatprep.subr.bf16.mxu0 %v3597_v41 }
 0x192   :  { %3028 = vmatpush3.bf16.msra.mxu1 %v3224_v16 }
 0x193   :  { %3029 = vmatprep.subr.bf16.mxu1 %v3471_v0 }
 0x194   :  { %1091 = vmatpush1.bf16.msra.mxu0 %v3601_v43 }
 0x195   :  { %1092 = vmatprep.subr.bf16.mxu0 %v3604_v44 }
 0x196   :  { %3030 = vmatpush3.bf16.msra.mxu1 %v3225_v17 }
 0x197   :  { %3031 = vmatprep.subr.bf16.mxu1 %v3471_v0 }
 0x198   :  { %1093 = vmatpush1.bf16.msra.mxu0 %v3608_v46 }
 0x199   :  { %1094 = vmatprep.subr.bf16.mxu0 %v3611_v47 }
 0x19c   :  { %1095 = vmatpush1.bf16.msra.mxu0 %v3615_v49 }
 0x19d   :  { %1368 = vmatprep.subr.bf16.mxu0 %v3562_v26  ;;  %v3226_v26 = vld [vmem:[#allocation8 + $0x98] ss:$12 sps:$4 sm:$0xff]  }
 0x19e   :  { %3032 = vmatpush3.bf16.msra.mxu1 %v3226_v26 }
 0x19f   :  { %3033 = vmatprep.subr.bf16.mxu1 %v3471_v0 }
 0x1a2   :  { %3034 = vmatpush3.bf16.msra.mxu1 %v3227_v18 }
 0x1a3   :  { %3039 = vmatprep.subr.bf16.mxu1 %v3471_v0 }
 0x252   :  { %v826_v22 = vpop.f32.mrb[8].mxu0  ;;  %v867_v23 = vpop.f32.mrb[8].mxu1 }
 0x253   :  { %v827_v24 = vadd.f32 %v826_v22, %v780_v20  ;;  %v828_v27 = vpop.f32.mrb[9].mxu0  ;;  %v3017_v30 = vpop.f32.mrb[9].mxu1  ;;  %v868_v60 = vadd.f32 %v867_v23, %v788_v58  ;;  %v3764_v58 = vld [vmem:[#allocation8] ss:$12 sps:$4 sm:$0xff]  }
 0x254   :  { %v829_v33 = vadd.f32 %v828_v27, %v784_v21  ;;  %v830_v36 = vpop.f32.mrb[10].mxu0  ;;  %v870_v39 = vpop.f32.mrb[10].mxu1 }
 0x255   :  { %v875_v42 = vadd.f32 %v874_v25, %v827_v24  ;;  %v831_v45 = vpop.f32.mrb[11].mxu0  ;;  %v3018_v48 = vpop.f32.mrb[11].mxu1 }
 0x256   :  { %v885_v53 = vadd.f32 %v883_v51, %v829_v33 }
 0x257   :  { %v2720_v52 = vmul.f32 -1.442695, %v875_v42 }
 0x258   :  { %v2721_v54 = vmul.f32 -1.442695, %v885_v53 }
 0x259   :  { %3302 = vpow2.f32 %v2720_v52 }
 0x25a   :  { %3304 = vpow2.f32 %v2721_v54 }
 0x263   :  { %v3303_v55 = vpop.eup %3302 }
 0x264   :  { %v879_v56 = vadd.f32 1.0, %v3303_v55  ;;  %v3305_v57 = vpop.eup %3304 }
 0x265   :  { %v889_v59 = vadd.f32 1.0, %v3305_v57  ;;  %v3762_v57 = vld [vmem:[#allocation8 + $0x4] ss:$12 sps:$4 sm:$0xff]  }
 0x266   :  { %3306 = vrcp.f32 %v879_v56 }
 0x267   :  { %3308 = vrcp.f32 %v889_v59  ;;  %v3239_v59 = vld [vmem:[#allocation8 + $0x8] ss:$12 sps:$4 sm:$0xff]  }
 0x270   :  { %v3307_v61 = vpop.eup %3306 }
 0x271   :  { %v892_v62 = vmul.f32 %v3307_v61, %v868_v60  ;;  %v3309_v6 = vpop.eup %3308  ;;  %v3768_v60 = vld [vmem:[#allocation8 + $0x1c] ss:$12 sps:$4 sm:$0xff]   ;;  %v3771_v61 = vld [vmem:[#allocation8 + $0x18] ss:$12 sps:$4 sm:$0xff]  }
 0x272   :  { %v897_v7 = vsub.f32 1.0, %v3309_v6  ;;  %v899_v10 = vmul.f32 %v3309_v6, %v3677_v11  ;;  %v3247_v6 = vld [vmem:[#allocation8 + $0x38] ss:$12 sps:$4 sm:$0xff]  }
 0x273   :  { %v895_v5 = vadd.f32 %v893_v2, %v892_v62  ;;  %v3243_v62 = vld [vmem:[#allocation8 + $0x20] ss:$12 sps:$4 sm:$0xff]  }
 0x274   :  { %v3775_v2 = vld [vmem:[#allocation8 + $0x34] ss:$12 sps:$4 sm:$0xff]  }
 0x275   :  { %3310 = vtanh.f32 %v895_v5  ;;  %v3778_v5 = vld [vmem:[#allocation8 + $0x30] ss:$12 sps:$4 sm:$0xff]  }
 0x27f   :  { %v3311_v8 = vpop.eup %3310 }
 0x280   :  { %v898_v9 = vmul.f32 %v3311_v8, %v897_v7  ;;  %v3782_v7 = vld [vmem:[#allocation8 + $0x4c] ss:$12 sps:$4 sm:$0xff]   ;;  %v3785_v8 = vld [vmem:[#allocation8 + $0x48] ss:$12 sps:$4 sm:$0xff]  }
 0x282   :  { %v3716_v12 = vadd.f32 %v899_v10, %v898_v9  ;;  %v3251_v9 = vld [vmem:[#allocation8 + $0x50] ss:$12 sps:$4 sm:$0xff]   ;;  %v3789_v10 = vld [vmem:[#allocation8 + $0x60] ss:$12 sps:$4 sm:$0xff]  }
 0x284   :  { %901 = vst [vmem:[#allocation9 + $0x1] sm:$0x1] %v3716_v12  ;;  %v902_v50 = vpack.c.bf16 %v3716_v12, %v3716_v12 }
 0x286   :  { %1113 = vmatmul.mubr.bf16.vlgmr.msra.gmra.mrb[12].mxu0 %v902_v50  ;;  %3036 = vmatmul.mubr.bf16.vlgmr.msra.gmra.mrb[12].mxu1 %v902_v50  ;;  %v3255_v50 = vld [vmem:[#allocation8 + $0x68] ss:$12 sps:$4 sm:$0xff]  }
 0x287   :  { %1369 = vmatpush1.bf16.msra.mxu0 %v3565_v28  ;;  %1400 = vmatprep.mubr.bf16.mxu0 %v3472_v1  ;;  %v3228_v28 = vld [vmem:[#allocation8 + $0x8] ss:$12 sps:$4 sm:$0xff]  }
 0x288   :  { %1370 = vmatprep.subr.bf16.mxu0 %v3567_v29  ;;  %3055 = vmatprep.mubr.msk.bf16.mxu1 %vm3473_vm0, %v3471_v0  ;;  %v3229_v29 = vld [vmem:[#allocation8 + $0x20] ss:$12 sps:$4 sm:$0xff]  }
 0x289   :  { %3040 = vmatpush3.bf16.msra.mxu1 %v3228_v28  ;;  %v3794_v28 = vld [vmem:[#allocation8 + $0x7c] ss:$12 sps:$4 sm:$0xff]  }
 0x28a   :  { %3041 = vmatprep.subr.bf16.mxu1 %v3471_v0 }
 0x28b   :  { %1371 = vmatpush1.bf16.msra.mxu0 %v3571_v31  ;;  %v3230_v31 = vld [vmem:[#allocation8 + $0x38] ss:$12 sps:$4 sm:$0xff]  }
 0x28c   :  { %1372 = vmatprep.subr.bf16.mxu0 %v3574_v32  ;;  %v3231_v32 = vld [vmem:[#allocation8 + $0x50] ss:$12 sps:$4 sm:$0xff]  }
 0x28d   :  { %3042 = vmatpush3.bf16.msra.mxu1 %v3229_v29  ;;  %v3798_v29 = vld [vmem:[#allocation8 + $0x78] ss:$12 sps:$4 sm:$0xff]  }
 0x28e   :  { %3043 = vmatprep.subr.bf16.mxu1 %v3471_v0 }
 0x28f   :  { %1373 = vmatpush1.bf16.msra.mxu0 %v3577_v34  ;;  %v3232_v34 = vld [vmem:[#allocation8 + $0x68] ss:$12 sps:$4 sm:$0xff]  }
 0x290   :  { %1374 = vmatprep.subr.bf16.mxu0 %v3581_v35  ;;  %v3233_v35 = vld [vmem:[#allocation8 + $0x80] ss:$12 sps:$4 sm:$0xff]  }
 0x291   :  { %3044 = vmatpush3.bf16.msra.mxu1 %v3230_v31  ;;  %v3259_v31 = vld [vmem:[#allocation8 + $0x80] ss:$12 sps:$4 sm:$0xff]  }
 0x292   :  { %3045 = vmatprep.subr.bf16.mxu1 %v3471_v0 }
 0x293   :  { %1375 = vmatpush1.bf16.msra.mxu0 %v3587_v37  ;;  %v3234_v37 = vld [vmem:[#allocation8 + $0x98] ss:$12 sps:$4 sm:$0xff]  }
 0x294   :  { %1376 = vmatprep.subr.bf16.mxu0 %v3590_v38  ;;  %v3235_v38 = vld [vmem:[#allocation8 + $0xb0] ss:$12 sps:$4 sm:$0xff]  }
 0x295   :  { %3046 = vmatpush3.bf16.msra.mxu1 %v3231_v32  ;;  %v3802_v32 = vld [vmem:[#allocation8 + $0x94] ss:$12 sps:$4 sm:$0xff]  }
 0x296   :  { %3047 = vmatprep.subr.bf16.mxu1 %v3471_v0 }
 0x297   :  { %1377 = vmatpush1.bf16.msra.mxu0 %v3594_v40  ;;  %v935_v40 = vld [vmem:[%s3964_s5] sm:$0x7] }
 0x298   :  { %1378 = vmatprep.subr.bf16.mxu0 %v3597_v41  ;;  %v1068_v41 = vrot.slane %v935_v40, %v3658_v63  ;;  %v1076_v27 = vrot.slane %v935_v40, %v3665_v4 }
 0x299   :  { %3048 = vmatpush3.bf16.msra.mxu1 %v3232_v34  ;;  %v3805_v34 = vld [vmem:[#allocation8 + $0x90] ss:$12 sps:$4 sm:$0xff]  }
 0x29a   :  { %3049 = vmatprep.subr.bf16.mxu1 %v3471_v0 }
 0x29b   :  { %1379 = vmatpush1.bf16.msra.mxu0 %v3601_v43  ;;  %v1072_v43 = vrot.slane %v935_v40, %v3663_v3  ;;  %v3267_v40 = vld [vmem:[#allocation8 + $0xb0] ss:$12 sps:$4 sm:$0xff]  }
 0x29c   :  { %1380 = vmatprep.subr.bf16.mxu0 %v3604_v44 }
 0x29d   :  { %3050 = vmatpush3.bf16.msra.mxu1 %v3233_v35  ;;  %v3263_v35 = vld [vmem:[#allocation8 + $0x98] ss:$12 sps:$4 sm:$0xff]  }
 0x29e   :  { %3051 = vmatprep.subr.bf16.mxu1 %v3471_v0 }
 0x29f   :  { %1381 = vmatpush1.bf16.msra.mxu0 %v3608_v46 }
 0x2a0   :  { %1382 = vmatprep.subr.bf16.mxu0 %v3611_v47 }
 0x2a1   :  { %3052 = vmatpush3.bf16.msra.mxu1 %v3234_v37  ;;  %v3809_v37 = vld [vmem:[#allocation8 + $0xac] ss:$12 sps:$4 sm:$0xff]  }
 0x2a2   :  { %3053 = vmatprep.subr.bf16.mxu1 %v3471_v0 }
 0x2a3   :  { %1383 = vmatpush1.bf16.msra.mxu0 %v3615_v49  ;;  %v1162_v49 = vld [vmem:[#allocation2 + $0x2] ss:$8 sm:$0x7] }
 0x2a4   :  { %v1171_v19 = vrot.slane %v1162_v49, 1  ;;  %v1181_v42 = vrot.slane %v1162_v49, 2  ;;  %1656 = vmatprep.subr.bf16.mxu0 %v3762_v57 }
 0x2a5   :  { %3054 = vmatpush3.bf16.msra.mxu1 %v3235_v38  ;;  %v3812_v38 = vld [vmem:[#allocation8 + $0xa8] ss:$12 sps:$4 sm:$0xff]  }
 0x2a6   :  { %3059 = vmatprep.subr.bf16.mxu1 %v3471_v0 }
 0x359   :  { %v1114_v44 = vpop.f32.mrb[12].mxu0  ;;  %v1155_v46 = vpop.f32.mrb[12].mxu1 }
 0x35a   :  { %v1115_v47 = vadd.f32 %v1114_v44, %v1068_v41  ;;  %v1116_v11 = vpop.f32.mrb[13].mxu0  ;;  %v3037_v13 = vpop.f32.mrb[13].mxu1  ;;  %v1156_v33 = vadd.f32 %v1155_v46, %v1076_v27  ;;  %v1223_v41 = vld [vmem:[%s3964_s5] sm:$0x7] }
 0x35b   :  { %v1117_v14 = vadd.f32 %v1116_v11, %v1072_v43  ;;  %v1118_v15 = vpop.f32.mrb[14].mxu0  ;;  %v1158_v16 = vpop.f32.mrb[14].mxu1  ;;  %v1356_v43 = vrot.slane %v1223_v41, %v3658_v63  ;;  %v1360_v44 = vrot.slane %v1223_v41, %v3663_v3  ;;  %v1450_v11 = vld [vmem:[#allocation2 + $0x3] ss:$8 sm:$0x7] }
 0x35c   :  { %v1163_v17 = vadd.f32 %v1162_v49, %v1115_v47  ;;  %v1119_v26 = vpop.f32.mrb[15].mxu0  ;;  %v3038_v18 = vpop.f32.mrb[15].mxu1 }
 0x35d   :  { %v1173_v21 = vadd.f32 %v1171_v19, %v1117_v14 }
 0x35e   :  { %v2746_v20 = vmul.f32 -1.442695, %v1163_v17 }
 0x35f   :  { %v2747_v22 = vmul.f32 -1.442695, %v1173_v21 }
 0x360   :  { %3312 = vpow2.f32 %v2746_v20  ;;  %v1459_v20 = vrot.slane %v1450_v11, 1 }
 0x361   :  { %3314 = vpow2.f32 %v2747_v22 }
 0x36a   :  { %v3313_v23 = vpop.eup %3312 }
 0x36b   :  { %v1167_v24 = vadd.f32 1.0, %v3313_v23  ;;  %v3315_v25 = vpop.eup %3314 }
 0x36c   :  { %v1177_v30 = vadd.f32 1.0, %v3315_v25 }
 0x36d   :  { %3316 = vrcp.f32 %v1167_v24 }
 0x36e   :  { %3318 = vrcp.f32 %v1177_v30  ;;  %v1364_v30 = vrot.slane %v1223_v41, %v3665_v4  ;;  %v3275_v41 = vld [vmem:[#allocation8 + $0xb0] ss:$12 sps:$4 sm:$0xff]  }
 0x377   :  { %v3317_v36 = vpop.eup %3316 }
 0x378   :  { %v1180_v39 = vmul.f32 %v3317_v36, %v1156_v33  ;;  %v3319_v48 = vpop.eup %3318 }
 0x379   :  { %v1185_v51 = vsub.f32 1.0, %v3319_v48  ;;  %v1187_v54 = vmul.f32 %v3319_v48, %v3716_v12  ;;  %v3791_v12 = vld [vmem:[#allocation8 + $0x64] ss:$12 sps:$4 sm:$0xff]  }
 0x37a   :  { %v1183_v45 = vadd.f32 %v1181_v42, %v1180_v39 }
 0x37c   :  { %3320 = vtanh.f32 %v1183_v45  ;;  %v1469_v45 = vrot.slane %v1450_v11, 2 }
 0x386   :  { %v3321_v52 = vpop.eup %3320 }
 0x387   :  { %v1186_v53 = vmul.f32 %v3321_v52, %v1185_v51 }
 0x389   :  { %v3754_v55 = vadd.f32 %v1187_v54, %v1186_v53 }
 0x38b   :  { %1189 = vst [vmem:[#allocation9 + $0x2] sm:$0x1] %v3754_v55  ;;  %v1190_v56 = vpack.c.bf16 %v3754_v55, %v3754_v55 }
 0x38d   :  { %1401 = vmatmul.mubr.bf16.vlgmr.msra.gmra.mrb[16].mxu0 %v1190_v56  ;;  %3056 = vmatmul.mubr.bf16.vlgmr.msra.gmra.mrb[16].mxu1 %v1190_v56 }
 0x38e   :  { %1688 = vmatprep.mubr.bf16.mxu0 %v3472_v1  ;;  %3075 = vmatprep.mubr.msk.bf16.mxu1 %vm3473_vm0, %v3471_v0 }
 0x38f   :  { %1657 = vmatpush1.bf16.msra.mxu0 %v3764_v58  ;;  %3060 = vmatpush3.bf16.msra.mxu1 %v3239_v59 }
 0x390   :  { %3061 = vmatprep.subr.bf16.mxu1 %v3471_v0  ;;  %1658 = vmatprep.subr.bf16.mxu0 %v3768_v60 }
 0x393   :  { %1659 = vmatpush1.bf16.msra.mxu0 %v3771_v61  ;;  %3062 = vmatpush3.bf16.msra.mxu1 %v3243_v62 }
 0x394   :  { %3063 = vmatprep.subr.bf16.mxu1 %v3471_v0  ;;  %1660 = vmatprep.subr.bf16.mxu0 %v3775_v2 }
 0x397   :  { %1661 = vmatpush1.bf16.msra.mxu0 %v3778_v5  ;;  %3064 = vmatpush3.bf16.msra.mxu1 %v3247_v6  ;;  %v3269_v6 = vld [vmem:[#allocation8 + $0x20] ss:$12 sps:$4 sm:$0xff]  }
 0x398   :  { %3065 = vmatprep.subr.bf16.mxu1 %v3471_v0  ;;  %1662 = vmatprep.subr.bf16.mxu0 %v3782_v7 }
 0x39b   :  { %1663 = vmatpush1.bf16.msra.mxu0 %v3785_v8  ;;  %3066 = vmatpush3.bf16.msra.mxu1 %v3251_v9  ;;  %v3270_v9 = vld [vmem:[#allocation8 + $0x38] ss:$12 sps:$4 sm:$0xff]  }
 0x39c   :  { %3067 = vmatprep.subr.bf16.mxu1 %v3471_v0  ;;  %1664 = vmatprep.subr.bf16.mxu0 %v3791_v12 }
 0x39f   :  { %1665 = vmatpush1.bf16.msra.mxu0 %v3789_v10  ;;  %3068 = vmatpush3.bf16.msra.mxu1 %v3255_v50  ;;  %v3271_v50 = vld [vmem:[#allocation8 + $0x50] ss:$12 sps:$4 sm:$0xff]  }
 0x3a0   :  { %1666 = vmatprep.subr.bf16.mxu0 %v3794_v28  ;;  %3069 = vmatprep.subr.bf16.mxu1 %v3471_v0 }
 0x3a3   :  { %1667 = vmatpush1.bf16.msra.mxu0 %v3798_v29  ;;  %3070 = vmatpush3.bf16.msra.mxu1 %v3259_v31  ;;  %v3272_v31 = vld [vmem:[#allocation8 + $0x68] ss:$12 sps:$4 sm:$0xff]  }
 0x3a4   :  { %1668 = vmatprep.subr.bf16.mxu0 %v3802_v32  ;;  %3071 = vmatprep.subr.bf16.mxu1 %v3471_v0 }
 0x3a7   :  { %1669 = vmatpush1.bf16.msra.mxu0 %v3805_v34  ;;  %3072 = vmatpush3.bf16.msra.mxu1 %v3263_v35  ;;  %v3273_v35 = vld [vmem:[#allocation8 + $0x80] ss:$12 sps:$4 sm:$0xff]  }
 0x3a8   :  { %1670 = vmatprep.subr.bf16.mxu0 %v3809_v37  ;;  %3073 = vmatprep.subr.bf16.mxu1 %v3471_v0 }
 0x3ab   :  { %1671 = vmatpush1.bf16.msra.mxu0 %v3812_v38  ;;  %3074 = vmatpush3.bf16.msra.mxu1 %v3267_v40  ;;  %v3274_v40 = vld [vmem:[#allocation8 + $0x98] ss:$12 sps:$4 sm:$0xff]  }
 0x3ac   :  { %1944 = vmatprep.subr.bf16.mxu0 %v3762_v57  ;;  %3079 = vmatprep.subr.bf16.mxu1 %v3471_v0 }
 0x460   :  { %v1402_v46 = vpop.f32.mrb[16].mxu0  ;;  %v1443_v47 = vpop.f32.mrb[16].mxu1 }
 0x461   :  { %v1403_v49 = vadd.f32 %v1402_v46, %v1356_v43  ;;  %v1404_v13 = vpop.f32.mrb[17].mxu0  ;;  %v3057_v14 = vpop.f32.mrb[17].mxu1  ;;  %v1444_v36 = vadd.f32 %v1443_v47, %v1364_v30  ;;  %v1511_v43 = vld [vmem:[%s3964_s5] sm:$0x7] }
 0x462   :  { %v1405_v15 = vadd.f32 %v1404_v13, %v1360_v44  ;;  %v1406_v16 = vpop.f32.mrb[18].mxu0  ;;  %v1446_v17 = vpop.f32.mrb[18].mxu1  ;;  %v1644_v44 = vrot.slane %v1511_v43, %v3658_v63  ;;  %v1648_v46 = vrot.slane %v1511_v43, %v3663_v3  ;;  %v1738_v13 = vld [vmem:[#allocation2 + $0x4] ss:$8 sm:$0x7] }
 0x463   :  { %v1451_v26 = vadd.f32 %v1450_v11, %v1403_v49  ;;  %v1407_v18 = vpop.f32.mrb[19].mxu0  ;;  %v3058_v19 = vpop.f32.mrb[19].mxu1 }
 0x464   :  { %v1461_v22 = vadd.f32 %v1459_v20, %v1405_v15 }
 0x465   :  { %v2772_v21 = vmul.f32 -1.442695, %v1451_v26 }
 0x466   :  { %v2773_v23 = vmul.f32 -1.442695, %v1461_v22 }
 0x467   :  { %3322 = vpow2.f32 %v2772_v21  ;;  %v1747_v21 = vrot.slane %v1738_v13, 1 }
 0x468   :  { %3324 = vpow2.f32 %v2773_v23 }
 0x471   :  { %v3323_v24 = vpop.eup %3322 }
 0x472   :  { %v1455_v25 = vadd.f32 1.0, %v3323_v24  ;;  %v3325_v27 = vpop.eup %3324 }
 0x473   :  { %v1465_v33 = vadd.f32 1.0, %v3325_v27 }
 0x474   :  { %3326 = vrcp.f32 %v1455_v25 }
 0x475   :  { %3328 = vrcp.f32 %v1465_v33  ;;  %v1652_v33 = vrot.slane %v1511_v43, %v3665_v4  ;;  %v1799_v43 = vld [vmem:[%s3964_s5] sm:$0x7] }
 0x47e   :  { %v3327_v39 = vpop.eup %3326 }
 0x47f   :  { %v1468_v42 = vmul.f32 %v3327_v39, %v1444_v36  ;;  %v3329_v51 = vpop.eup %3328 }
 0x480   :  { %v1473_v52 = vsub.f32 1.0, %v3329_v51  ;;  %v1475_v56 = vmul.f32 %v3329_v51, %v3754_v55  ;;  %v3268_v55 = vld [vmem:[#allocation8 + $0x8] ss:$12 sps:$4 sm:$0xff]  }
 0x481   :  { %v1471_v48 = vadd.f32 %v1469_v45, %v1468_v42 }
 0x483   :  { %3330 = vtanh.f32 %v1471_v48  ;;  %v1757_v48 = vrot.slane %v1738_v13, 2 }
 0x48d   :  { %v3331_v53 = vpop.eup %3330 }
 0x48e   :  { %v1474_v54 = vmul.f32 %v3331_v53, %v1473_v52 }
 0x490   :  { %v3826_v59 = vadd.f32 %v1475_v56, %v1474_v54 }
 0x492   :  { %1477 = vst [vmem:[#allocation9 + $0x3] sm:$0x1] %v3826_v59  ;;  %v1478_v62 = vpack.c.bf16 %v3826_v59, %v3826_v59 }
 0x494   :  { %1689 = vmatmul.mubr.bf16.vlgmr.msra.gmra.mrb[20].mxu0 %v1478_v62  ;;  %3076 = vmatmul.mubr.bf16.vlgmr.msra.gmra.mrb[20].mxu1 %v1478_v62 }
 0x495   :  { %1945 = vmatpush1.bf16.msra.mxu0 %v3764_v58  ;;  %1976 = vmatprep.mubr.bf16.mxu0 %v3472_v1 }
 0x496   :  { %1946 = vmatprep.subr.bf16.mxu0 %v3768_v60  ;;  %3095 = vmatprep.mubr.msk.bf16.mxu1 %vm3473_vm0, %v3471_v0 }
 0x497   :  { %3080 = vmatpush3.bf16.msra.mxu1 %v3268_v55 }
 0x498   :  { %3081 = vmatprep.subr.bf16.mxu1 %v3471_v0 }
 0x499   :  { %1947 = vmatpush1.bf16.msra.mxu0 %v3771_v61 }
 0x49a   :  { %1948 = vmatprep.subr.bf16.mxu0 %v3775_v2 }
 0x49b   :  { %3082 = vmatpush3.bf16.msra.mxu1 %v3269_v6 }
 0x49c   :  { %3083 = vmatprep.subr.bf16.mxu1 %v3471_v0 }
 0x49d   :  { %1949 = vmatpush1.bf16.msra.mxu0 %v3778_v5 }
 0x49e   :  { %1950 = vmatprep.subr.bf16.mxu0 %v3782_v7 }
 0x49f   :  { %3084 = vmatpush3.bf16.msra.mxu1 %v3270_v9  ;;  %v3277_v9 = vld [vmem:[#allocation8 + $0x20] ss:$12 sps:$4 sm:$0xff]  }
 0x4a0   :  { %3085 = vmatprep.subr.bf16.mxu1 %v3471_v0 }
 0x4a1   :  { %1951 = vmatpush1.bf16.msra.mxu0 %v3785_v8 }
 0x4a2   :  { %1952 = vmatprep.subr.bf16.mxu0 %v3791_v12 }
 0x4a3   :  { %3086 = vmatpush3.bf16.msra.mxu1 %v3271_v50  ;;  %v3278_v50 = vld [vmem:[#allocation8 + $0x38] ss:$12 sps:$4 sm:$0xff]  }
 0x4a4   :  { %3087 = vmatprep.subr.bf16.mxu1 %v3471_v0 }
 0x4a5   :  { %1953 = vmatpush1.bf16.msra.mxu0 %v3789_v10 }
 0x4a6   :  { %1954 = vmatprep.subr.bf16.mxu0 %v3794_v28 }
 0x4a7   :  { %3088 = vmatpush3.bf16.msra.mxu1 %v3272_v31  ;;  %v3279_v31 = vld [vmem:[#allocation8 + $0x50] ss:$12 sps:$4 sm:$0xff]  }
 0x4a8   :  { %3089 = vmatprep.subr.bf16.mxu1 %v3471_v0 }
 0x4a9   :  { %1955 = vmatpush1.bf16.msra.mxu0 %v3798_v29 }
 0x4aa   :  { %1956 = vmatprep.subr.bf16.mxu0 %v3802_v32 }
 0x4ab   :  { %3090 = vmatpush3.bf16.msra.mxu1 %v3273_v35  ;;  %v3280_v35 = vld [vmem:[#allocation8 + $0x68] ss:$12 sps:$4 sm:$0xff]  }
 0x4ac   :  { %3091 = vmatprep.subr.bf16.mxu1 %v3471_v0 }
 0x4ad   :  { %1957 = vmatpush1.bf16.msra.mxu0 %v3805_v34 }
 0x4ae   :  { %1958 = vmatprep.subr.bf16.mxu0 %v3809_v37 }
 0x4af   :  { %3092 = vmatpush3.bf16.msra.mxu1 %v3274_v40  ;;  %v3281_v40 = vld [vmem:[#allocation8 + $0x80] ss:$12 sps:$4 sm:$0xff]  }
 0x4b0   :  { %3093 = vmatprep.subr.bf16.mxu1 %v3471_v0 }
 0x4b1   :  { %1959 = vmatpush1.bf16.msra.mxu0 %v3812_v38 }
 0x4b2   :  { %2232 = vmatprep.subr.bf16.mxu0 %v3762_v57 }
 0x4b3   :  { %3094 = vmatpush3.bf16.msra.mxu1 %v3275_v41  ;;  %v3283_v41 = vld [vmem:[#allocation8 + $0xb0] ss:$12 sps:$4 sm:$0xff]  }
 0x4b4   :  { %3099 = vmatprep.subr.bf16.mxu1 %v3471_v0 }
 0x567   :  { %v1690_v47 = vpop.f32.mrb[20].mxu0  ;;  %v1731_v49 = vpop.f32.mrb[20].mxu1 }
 0x568   :  { %v1691_v11 = vadd.f32 %v1690_v47, %v1644_v44  ;;  %v1692_v14 = vpop.f32.mrb[21].mxu0  ;;  %v3077_v15 = vpop.f32.mrb[21].mxu1  ;;  %v1732_v39 = vadd.f32 %v1731_v49, %v1652_v33  ;;  %v1932_v44 = vrot.slane %v1799_v43, %v3658_v63  ;;  %v1940_v33 = vrot.slane %v1799_v43, %v3665_v4 }
 0x569   :  { %v1693_v16 = vadd.f32 %v1692_v14, %v1648_v46  ;;  %v1694_v17 = vpop.f32.mrb[22].mxu0  ;;  %v1734_v26 = vpop.f32.mrb[22].mxu1  ;;  %v1936_v46 = vrot.slane %v1799_v43, %v3663_v3 }
 0x56a   :  { %v1739_v18 = vadd.f32 %v1738_v13, %v1691_v11  ;;  %v1695_v19 = vpop.f32.mrb[23].mxu0  ;;  %v3078_v20 = vpop.f32.mrb[23].mxu1  ;;  %v2026_v13 = vld [vmem:[#allocation2 + $0x5] ss:$8 sm:$0x7] }
 0x56b   :  { %v1749_v23 = vadd.f32 %v1747_v21, %v1693_v16  ;;  %v2035_v21 = vrot.slane %v2026_v13, 1 }
 0x56c   :  { %v2798_v22 = vmul.f32 -1.442695, %v1739_v18 }
 0x56d   :  { %v2799_v24 = vmul.f32 -1.442695, %v1749_v23 }
 0x56e   :  { %3332 = vpow2.f32 %v2798_v22 }
 0x56f   :  { %3334 = vpow2.f32 %v2799_v24 }
 0x578   :  { %v3333_v25 = vpop.eup %3332 }
 0x579   :  { %v1743_v27 = vadd.f32 1.0, %v3333_v25  ;;  %v3335_v30 = vpop.eup %3334 }
 0x57a   :  { %v1753_v36 = vadd.f32 1.0, %v3335_v30 }
 0x57b   :  { %3336 = vrcp.f32 %v1743_v27 }
 0x57c   :  { %3338 = vrcp.f32 %v1753_v36 }
 0x585   :  { %v3337_v42 = vpop.eup %3336 }
 0x586   :  { %v1756_v45 = vmul.f32 %v3337_v42, %v1732_v39  ;;  %v3339_v52 = vpop.eup %3338 }
 0x587   :  { %v1761_v53 = vsub.f32 1.0, %v3339_v52  ;;  %v1763_v62 = vmul.f32 %v3339_v52, %v3826_v59  ;;  %v3276_v59 = vld [vmem:[#allocation8 + $0x8] ss:$12 sps:$4 sm:$0xff]  }
 0x588   :  { %v1759_v51 = vadd.f32 %v1757_v48, %v1756_v45  ;;  %v2045_v48 = vrot.slane %v2026_v13, 2 }
 0x58a   :  { %3340 = vtanh.f32 %v1759_v51 }
 0x594   :  { %v3341_v54 = vpop.eup %3340 }
 0x595   :  { %v1762_v56 = vmul.f32 %v3341_v54, %v1761_v53 }
 0x597   :  { %v3865_v55 = vadd.f32 %v1763_v62, %v1762_v56 }
 0x599   :  { %1765 = vst [vmem:[#allocation9 + $0x4] sm:$0x1] %v3865_v55  ;;  %v1766_v6 = vpack.c.bf16 %v3865_v55, %v3865_v55 }
 0x59b   :  { %1977 = vmatmul.mubr.bf16.vlgmr.msra.gmra.mrb[24].mxu0 %v1766_v6  ;;  %3096 = vmatmul.mubr.bf16.vlgmr.msra.gmra.mrb[24].mxu1 %v1766_v6 }
 0x59c   :  { %2233 = vmatpush1.bf16.msra.mxu0 %v3764_v58  ;;  %2264 = vmatprep.mubr.bf16.mxu0 %v3472_v1 }
 0x59d   :  { %2234 = vmatprep.subr.bf16.mxu0 %v3768_v60  ;;  %3115 = vmatprep.mubr.msk.bf16.mxu1 %vm3473_vm0, %v3471_v0 }
 0x59e   :  { %3100 = vmatpush3.bf16.msra.mxu1 %v3276_v59 }
 0x59f   :  { %3101 = vmatprep.subr.bf16.mxu1 %v3471_v0 }
 0x5a0   :  { %2235 = vmatpush1.bf16.msra.mxu0 %v3771_v61 }
 0x5a1   :  { %2236 = vmatprep.subr.bf16.mxu0 %v3775_v2 }
 0x5a2   :  { %3102 = vmatpush3.bf16.msra.mxu1 %v3277_v9 }
 0x5a3   :  { %3103 = vmatprep.subr.bf16.mxu1 %v3471_v0 }
 0x5a4   :  { %2237 = vmatpush1.bf16.msra.mxu0 %v3778_v5 }
 0x5a5   :  { %2238 = vmatprep.subr.bf16.mxu0 %v3782_v7 }
 0x5a6   :  { %3104 = vmatpush3.bf16.msra.mxu1 %v3278_v50 }
 0x5a7   :  { %3105 = vmatprep.subr.bf16.mxu1 %v3471_v0 }
 0x5a8   :  { %2239 = vmatpush1.bf16.msra.mxu0 %v3785_v8 }
 0x5a9   :  { %2240 = vmatprep.subr.bf16.mxu0 %v3791_v12 }
 0x5aa   :  { %3106 = vmatpush3.bf16.msra.mxu1 %v3279_v31 }
 0x5ab   :  { %3107 = vmatprep.subr.bf16.mxu1 %v3471_v0 }
 0x5ac   :  { %2241 = vmatpush1.bf16.msra.mxu0 %v3789_v10 }
 0x5ad   :  { %2242 = vmatprep.subr.bf16.mxu0 %v3794_v28 }
 0x5ae   :  { %3108 = vmatpush3.bf16.msra.mxu1 %v3280_v35 }
 0x5af   :  { %3109 = vmatprep.subr.bf16.mxu1 %v3471_v0 }
 0x5b0   :  { %2243 = vmatpush1.bf16.msra.mxu0 %v3798_v29 }
 0x5b1   :  { %2244 = vmatprep.subr.bf16.mxu0 %v3802_v32 }
 0x5b2   :  { %3110 = vmatpush3.bf16.msra.mxu1 %v3281_v40 }
 0x5b3   :  { %3111 = vmatprep.subr.bf16.mxu1 %v3471_v0 }
 0x5b4   :  { %2245 = vmatpush1.bf16.msra.mxu0 %v3805_v34 }
 0x5b5   :  { %2246 = vmatprep.subr.bf16.mxu0 %v3809_v37 }
 0x5b8   :  { %2247 = vmatpush1.bf16.msra.mxu0 %v3812_v38 }
 0x5b9   :  { %2520 = vmatprep.subr.bf16.mxu0 %v3762_v57  ;;  %v3282_v57 = vld [vmem:[#allocation8 + $0x98] ss:$12 sps:$4 sm:$0xff]  }
 0x5ba   :  { %3112 = vmatpush3.bf16.msra.mxu1 %v3282_v57 }
 0x5bb   :  { %3113 = vmatprep.subr.bf16.mxu1 %v3471_v0 }
 0x5be   :  { %3114 = vmatpush3.bf16.msra.mxu1 %v3283_v41 }
 0x5bf   :  { %3119 = vmatprep.subr.bf16.mxu1 %v3471_v0 }
 0x66e   :  { %v1978_v47 = vpop.f32.mrb[24].mxu0  ;;  %v2019_v49 = vpop.f32.mrb[24].mxu1 }
 0x66f   :  { %v1979_v11 = vadd.f32 %v1978_v47, %v1932_v44  ;;  %v1980_v14 = vpop.f32.mrb[25].mxu0  ;;  %v3097_v15 = vpop.f32.mrb[25].mxu1  ;;  %v2020_v39 = vadd.f32 %v2019_v49, %v1940_v33 }
 0x670   :  { %v1981_v16 = vadd.f32 %v1980_v14, %v1936_v46  ;;  %v1982_v17 = vpop.f32.mrb[26].mxu0  ;;  %v2022_v26 = vpop.f32.mrb[26].mxu1 }
 0x671   :  { %v2027_v18 = vadd.f32 %v2026_v13, %v1979_v11  ;;  %v1983_v19 = vpop.f32.mrb[27].mxu0  ;;  %v3098_v20 = vpop.f32.mrb[27].mxu1 }
 0x672   :  { %v2037_v23 = vadd.f32 %v2035_v21, %v1981_v16 }
 0x673   :  { %v2824_v22 = vmul.f32 -1.442695, %v2027_v18 }
 0x674   :  { %v2825_v24 = vmul.f32 -1.442695, %v2037_v23 }
 0x675   :  { %3342 = vpow2.f32 %v2824_v22 }
 0x676   :  { %3344 = vpow2.f32 %v2825_v24 }
 0x67f   :  { %v3343_v25 = vpop.eup %3342 }
 0x680   :  { %v2031_v27 = vadd.f32 1.0, %v3343_v25  ;;  %v3345_v30 = vpop.eup %3344  ;;  %v2375_v25 = vld [vmem:[%s3964_s5] sm:$0x7] }
 0x681   :  { %v2041_v36 = vadd.f32 1.0, %v3345_v30  ;;  %v2512_v30 = vrot.slane %v2375_v25, %v3663_v3 }
 0x682   :  { %3346 = vrcp.f32 %v2031_v27  ;;  %v2508_v27 = vrot.slane %v2375_v25, %v3658_v63 }
 0x683   :  { %3348 = vrcp.f32 %v2041_v36 }
 0x68c   :  { %v3347_v42 = vpop.eup %3346 }
 0x68d   :  { %v2044_v45 = vmul.f32 %v3347_v42, %v2020_v39  ;;  %v3349_v52 = vpop.eup %3348  ;;  %v2602_v42 = vld [vmem:[#allocation2 + $0x7] ss:$8 sm:$0x7] }
 0x68e   :  { %v2049_v53 = vsub.f32 1.0, %v3349_v52  ;;  %v2051_v62 = vmul.f32 %v3349_v52, %v3865_v55 }
 0x68f   :  { %v2047_v51 = vadd.f32 %v2045_v48, %v2044_v45 }
 0x691   :  { %3350 = vtanh.f32 %v2047_v51 }
 0x69b   :  { %v3351_v54 = vpop.eup %3350 }
 0x69c   :  { %v2050_v56 = vmul.f32 %v3351_v54, %v2049_v53 }
 0x69e   :  { %v3904_v6 = vadd.f32 %v2051_v62, %v2050_v56 }
 0x6a0   :  { %2053 = vst [vmem:[#allocation9 + $0x5] sm:$0x1] %v3904_v6  ;;  %v2054_v59 = vpack.c.bf16 %v3904_v6, %v3904_v6 }
 0x6a2   :  { %2265 = vmatmul.mubr.bf16.vlgmr.msra.gmra.mrb[28].mxu0 %v2054_v59  ;;  %3116 = vmatmul.mubr.bf16.vlgmr.msra.gmra.mrb[28].mxu1 %v2054_v59 }
 0x6a3   :  { %2521 = vmatpush1.bf16.msra.mxu0 %v3764_v58  ;;  %2552 = vmatprep.mubr.bf16.mxu0 %v3472_v1  ;;  %v3284_v1 = vld [vmem:[#allocation8 + $0x8] ss:$12 sps:$4 sm:$0xff]   ;;  %v3285_v58 = vld [vmem:[#allocation8 + $0x20] ss:$12 sps:$4 sm:$0xff]  }
 0x6a4   :  { %2522 = vmatprep.subr.bf16.mxu0 %v3768_v60  ;;  %3135 = vmatprep.mubr.msk.bf16.mxu1 %vm3473_vm0, %v3471_v0  ;;  %v3286_v60 = vld [vmem:[#allocation8 + $0x38] ss:$12 sps:$4 sm:$0xff]  }
 0x6a5   :  { %3120 = vmatpush3.bf16.msra.mxu1 %v3284_v1 }
 0x6a6   :  { %3121 = vmatprep.subr.bf16.mxu1 %v3471_v0 }
 0x6a7   :  { %2523 = vmatpush1.bf16.msra.mxu0 %v3771_v61  ;;  %v3287_v61 = vld [vmem:[#allocation8 + $0x50] ss:$12 sps:$4 sm:$0xff]  }
 0x6a8   :  { %2524 = vmatprep.subr.bf16.mxu0 %v3775_v2  ;;  %v3288_v2 = vld [vmem:[#allocation8 + $0x68] ss:$12 sps:$4 sm:$0xff]  }
 0x6a9   :  { %3122 = vmatpush3.bf16.msra.mxu1 %v3285_v58 }
 0x6aa   :  { %3123 = vmatprep.subr.bf16.mxu1 %v3471_v0 }
 0x6ab   :  { %2525 = vmatpush1.bf16.msra.mxu0 %v3778_v5  ;;  %v3289_v5 = vld [vmem:[#allocation8 + $0x80] ss:$12 sps:$4 sm:$0xff]  }
 0x6ac   :  { %2526 = vmatprep.subr.bf16.mxu0 %v3782_v7  ;;  %v3290_v7 = vld [vmem:[#allocation8 + $0x98] ss:$12 sps:$4 sm:$0xff]  }
 0x6ad   :  { %3124 = vmatpush3.bf16.msra.mxu1 %v3286_v60 }
 0x6ae   :  { %3125 = vmatprep.subr.bf16.mxu1 %v3471_v0 }
 0x6af   :  { %2527 = vmatpush1.bf16.msra.mxu0 %v3785_v8  ;;  %v3291_v8 = vld [vmem:[#allocation8 + $0xb0] ss:$12 sps:$4 sm:$0xff]  }
 0x6b0   :  { %2528 = vmatprep.subr.bf16.mxu0 %v3791_v12 }
 0x6b1   :  { %3126 = vmatpush3.bf16.msra.mxu1 %v3287_v61  ;;  %v2516_v61 = vrot.slane %v2375_v25, %v3665_v4 }
 0x6b2   :  { %3127 = vmatprep.subr.bf16.mxu1 %v3471_v0 }
 0x6b3   :  { %2529 = vmatpush1.bf16.msra.mxu0 %v3789_v10  ;;  %v2087_v10 = vld [vmem:[%s3964_s5] sm:$0x7]  ;;  %s3474_s5 = smov [#allocation9]  }
 0x6b4   :  { %2530 = vmatprep.subr.bf16.mxu0 %v3794_v28  ;;  %v2220_v12 = vrot.slane %v2087_v10, %v3658_v63  ;;  %v2224_v28 = vrot.slane %v2087_v10, %v3663_v3  ;;  %v2228_v11 = vrot.slane %v2087_v10, %v3665_v4  ;;  %v2621_v10 = vrot.slane %v2602_v42, 2  ;;  %s2636_s25 = sshll.u32 %s3474_s5, 4  ;;  %s2637_s25 = int_to_ptr.vmem [resolvable:$true] %s2636_s25 }
 0x6b5   :  { %3128 = vmatpush3.bf16.msra.mxu1 %v3288_v2  ;;  %s3438_s26 = scalar_lea.vmem %s2637_s25, 128  ;;  %p3443_p11 = scmp.lt.s32.totalorder %s2637_s25, %s2637_s25 }
 0x6b6   :  { %3129 = vmatprep.subr.bf16.mxu1 %v3471_v0  ;;  %p3439_p10 = scmp.ne.s32.totalorder %s2637_s25, %s3438_s26  ;;  %p3444_p12 = scmp.lt.s32.totalorder %s3438_s26, %s3438_s26 }
 0x6b7   :  { %2531 = vmatpush1.bf16.msra.mxu0 %v3798_v29 }
 0x6b8   :  { %2532 = vmatprep.subr.bf16.mxu0 %v3802_v32  ;;  %p3445_p13 = por %p3444_p12, %p3443_p11 }
 0x6b9   :  { %3130 = vmatpush3.bf16.msra.mxu1 %v3289_v5 }
 0x6ba   :  { %3131 = vmatprep.subr.bf16.mxu1 %v3471_v0  ;;  %p3446_p0 = pnand %p3445_p13, %p3439_p10 }
 0x6bb   :  { %2533 = vmatpush1.bf16.msra.mxu0 %v3805_v34 }
 0x6bc   :  { %2534 = vmatprep.subr.bf16.mxu0 %v3809_v37  ;;  %v2314_v37 = vld [vmem:[#allocation2 + $0x6] ss:$8 sm:$0x7] }
 0x6bd   :  { %3132 = vmatpush3.bf16.msra.mxu1 %v3290_v7  ;;  %v2323_v57 = vrot.slane %v2314_v37, 1  ;;  %v2333_v17 = vrot.slane %v2314_v37, 2 }
 0x6be   :  { %3133 = vmatprep.subr.bf16.mxu1 %v3471_v0 }
 0x6bf   :  { %2535 = vmatpush1.bf16.msra.mxu0 %v3812_v38 }
 0x6c1   :  { %3134 = vmatpush3.bf16.msra.mxu1 %v3291_v8 }
 0x775   :  { %v2266_v29 = vpop.f32.mrb[28].mxu0  ;;  %v2307_v32 = vpop.f32.mrb[28].mxu1 }
 0x776   :  { %v2267_v34 = vadd.f32 %v2266_v29, %v2220_v12  ;;  %v2268_v38 = vpop.f32.mrb[29].mxu0  ;;  %v3117_v55 = vpop.f32.mrb[29].mxu1  ;;  %v2308_v14 = vadd.f32 %v2307_v32, %v2228_v11 }
 0x777   :  { %v2269_v9 = vadd.f32 %v2268_v38, %v2224_v28  ;;  %v2270_v50 = vpop.f32.mrb[30].mxu0  ;;  %v2310_v31 = vpop.f32.mrb[30].mxu1 }
 0x778   :  { %v2315_v35 = vadd.f32 %v2314_v37, %v2267_v34  ;;  %v2271_v0 = vpop.f32.mrb[31].mxu0  ;;  %v3118_v40 = vpop.f32.mrb[31].mxu1 }
 0x779   :  { %v2325_v43 = vadd.f32 %v2323_v57, %v2269_v9 }
 0x77a   :  { %v2850_v41 = vmul.f32 -1.442695, %v2315_v35 }
 0x77b   :  { %v2851_v44 = vmul.f32 -1.442695, %v2325_v43 }
 0x77c   :  { %3352 = vpow2.f32 %v2850_v41 }
 0x77d   :  { %3354 = vpow2.f32 %v2851_v44 }
 0x786   :  { %v3353_v46 = vpop.eup %3352 }
 0x787   :  { %v2319_v47 = vadd.f32 1.0, %v3353_v46  ;;  %v3355_v49 = vpop.eup %3354 }
 0x788   :  { %v2329_v13 = vadd.f32 1.0, %v3355_v49 }
 0x789   :  { %3356 = vrcp.f32 %v2319_v47 }
 0x78a   :  { %3358 = vrcp.f32 %v2329_v13 }
 0x793   :  { %v3357_v15 = vpop.eup %3356 }
 0x794   :  { %v2332_v16 = vmul.f32 %v3357_v15, %v2308_v14  ;;  %v3359_v18 = vpop.eup %3358 }
 0x795   :  { %v2337_v19 = vsub.f32 1.0, %v3359_v18  ;;  %v2339_v22 = vmul.f32 %v3359_v18, %v3904_v6  ;;  %v2611_v6 = vrot.slane %v2602_v42, 1 }
 0x796   :  { %v2335_v26 = vadd.f32 %v2333_v17, %v2332_v16 }
 0x798   :  { %3360 = vtanh.f32 %v2335_v26 }
 0x7a2   :  { %v3361_v20 = vpop.eup %3360 }
 0x7a3   :  { %v2338_v21 = vmul.f32 %v3361_v20, %v2337_v19 }
 0x7a5   :  { %v2340_v23 = vadd.f32 %v2339_v22, %v2338_v21 }
 0x7a7   :  { %2341 = vst [vmem:[#allocation9 + $0x6] sm:$0x1] %v2340_v23  ;;  %v2342_v24 = vpack.c.bf16 %v2340_v23, %v2340_v23 }
 0x7a9   :  { %2553 = vmatmul.mubr.bf16.vlgmr.msra.gmra.mrb[32].mxu0 %v2342_v24  ;;  %3136 = vmatmul.mubr.bf16.vlgmr.msra.gmra.mrb[32].mxu1 %v2342_v24 }
 0x87c   :  { %v2554_v33 = vpop.f32.mrb[32].mxu0  ;;  %v2595_v36 = vpop.f32.mrb[32].mxu1 }
 0x87d   :  { %v2555_v39 = vadd.f32 %v2554_v33, %v2508_v27  ;;  %v2556_v45 = vpop.f32.mrb[33].mxu0  ;;  %v3137_v48 = vpop.f32.mrb[33].mxu1  ;;  %v2596_v5 = vadd.f32 %v2595_v36, %v2516_v61 }
 0x87e   :  { %v2557_v51 = vadd.f32 %v2556_v45, %v2512_v30  ;;  %v2558_v52 = vpop.f32.mrb[34].mxu0  ;;  %v2598_v53 = vpop.f32.mrb[34].mxu1 }
 0x87f   :  { %v2603_v54 = vadd.f32 %v2602_v42, %v2555_v39  ;;  %v2559_v56 = vpop.f32.mrb[35].mxu0  ;;  %v3138_v62 = vpop.f32.mrb[35].mxu1 }
 0x880   :  { %v2613_v1 = vadd.f32 %v2611_v6, %v2557_v51 }
 0x881   :  { %v2876_v59 = vmul.f32 -1.442695, %v2603_v54 }
 0x882   :  { %v2877_v58 = vmul.f32 -1.442695, %v2613_v1 }
 0x883   :  { %3362 = vpow2.f32 %v2876_v59 }
 0x884   :  { %3364 = vpow2.f32 %v2877_v58 }
 0x88d   :  { %v3363_v63 = vpop.eup %3362 }
 0x88e   :  { %v2607_v3 = vadd.f32 1.0, %v3363_v63  ;;  %v3365_v60 = vpop.eup %3364 }
 0x88f   :  { %v2617_v2 = vadd.f32 1.0, %v3365_v60 }
 0x890   :  { %3366 = vrcp.f32 %v2607_v3 }
 0x891   :  { %3368 = vrcp.f32 %v2617_v2 }
 0x89a   :  { %v3367_v7 = vpop.eup %3366 }
 0x89b   :  { %v2620_v8 = vmul.f32 %v3367_v7, %v2596_v5  ;;  %v3369_v28 = vpop.eup %3368 }
 0x89c   :  { %v2625_v29 = vsub.f32 1.0, %v3369_v28  ;;  %v2627_v37 = vmul.f32 %v3369_v28, %v2340_v23 }
 0x89d   :  { %v2623_v12 = vadd.f32 %v2621_v10, %v2620_v8 }
 0x89f   :  { %3370 = vtanh.f32 %v2623_v12 }
 0x8a9   :  { %v3371_v32 = vpop.eup %3370 }
 0x8aa   :  { %v2626_v34 = vmul.f32 %v3371_v32, %v2625_v29 }
 0x8ac   :  { %v2628_v38 = vadd.f32 %v2627_v37, %v2626_v34 }
 0x8ae   :  { %2629 = vst [vmem:[#allocation9 + $0x7] sm:$0x1] %v2628_v38 }
 0x8af   :  { %3449 = shalt.err (!%p3446_p0)
}
 0x8b0   :  { %s3450_s29 = scalar_lea.hbm %s3965_s6, 128 }
 0x8b1   :  { %p3451_p1 = scmp.ne.s32.totalorder %s3965_s6, %s3450_s29  ;;  %p3454_p2 = scmp.lt.u32.totalorder %s3450_s29, %s3965_s6 }
 0x8b3   :  { %p3456_p3 = pnand %p3454_p2, %p3451_p1 }
 0x8b5   :  { %3459 = shalt.err (!%p3456_p3)
}
 0x8b6   :  { %2639 = dma.vmem_to_hbm [thread:$0]  %s2637_s25, 128, %s3965_s6, [#allocation5]  }
 0x8b7   :  { %3464 = dma.done.wait [#allocation5], 128  }
 0x8b8   :  { %3465 = vsyncadd [#allocation5], 4294967168 }
 0x8b9   :  { %2643 = vsyncpa [#allocation4], 1 }
 0x8ba   :  { %2644 = vsyncpa [#allocation7], 1 }
 0x8bb   :  { %2645 = vsyncpa [#allocation5], 1 }

</bundles_post_ra>
